<compile_context>
chip_gen: v6e
topology: v6e:2x2x1
jax: 0.10.0
libtpu: 0.0.40
codegen_flags: <defaults>
</compile_context>

<pallas_src>
import functools

import jax
import jax.numpy as jnp
from jax.experimental import pallas as pl
from jax.experimental.pallas import tpu as pltpu

BN_EPS = 1e-5
LANE = 128
_VMEM_FLOOR = 32 * 1024 * 1024   # Mosaic's default scoped-vmem limit
_VMEM_CAP = 56 * 1024 * 1024     # leave headroom under v7x's 64 MiB/TC


def _round_up(x, m):
    return (x + m - 1) // m * m


def _nbytes(shape, dtype):
    n = 1
    for d in shape:
        n *= int(d)
    return n * jnp.dtype(dtype).itemsize


def _cparams(vmem_est_bytes):
    limit = int(min(_VMEM_CAP, max(_VMEM_FLOOR, vmem_est_bytes)))
    return pltpu.CompilerParams(
        dimension_semantics=("parallel",),
        vmem_limit_bytes=limit)


# ---------------------------------------------------------------------------
# Kernel 1: conv1 (3x3/stride) [+ fused 1x1 shortcut conv] + per-image BN stats.
# Taps are folded into the matmul K dimension (one MXU matmul per branch).
# ---------------------------------------------------------------------------
def _stage1_kernel(x_ref, *rest, taps1, tap_s, Ho, Wo, cin_p, has_sc):
    if has_sc:
        w1_ref, ws_ref, raw1_ref, raws_ref, st1_ref, sts_ref = rest
    else:
        w1_ref, raw1_ref, st1_ref = rest

    x = x_ref[0]                                     # (Hs, Ws, phases*Cin_p) bf16

    def tap(ro, co, ph):
        sl = x[ro:ro + Ho, co:co + Wo, ph * cin_p:(ph + 1) * cin_p]
        return sl.reshape(Ho * Wo, cin_p)

    # implicit im2col: concat taps along K, single matmul (K = 9*Cin_p).
    patches = jnp.concatenate([tap(*t) for t in taps1], axis=-1)
    acc1 = jnp.dot(patches, w1_ref[...], preferred_element_type=jnp.float32)
    raw1_ref[0] = acc1.reshape(Ho, Wo, -1).astype(raw1_ref.dtype)   # bf16 writeback
    st1_ref[0] = jnp.concatenate(                                   # one (2,Cp) store
        [jnp.sum(acc1, axis=0, keepdims=True),
         jnp.sum(acc1 * acc1, axis=0, keepdims=True)], axis=0)

    if has_sc:
        accs = jnp.dot(tap(*tap_s), ws_ref[...],
                       preferred_element_type=jnp.float32)
        raws_ref[0] = accs.astype(raws_ref.dtype)
        sts_ref[0] = jnp.concatenate(
            [jnp.sum(accs, axis=0, keepdims=True),
             jnp.sum(accs * accs, axis=0, keepdims=True)], axis=0)


def _stage1(x_s2d, w1, ws, taps1, tap_s, Ho, Wo, cin_p, cout_p):
    N, Hs, Ws, Cs = x_s2d.shape
    has_sc = ws is not None
    kern = functools.partial(_stage1_kernel, taps1=taps1, tap_s=tap_s,
                             Ho=Ho, Wo=Wo, cin_p=cin_p, has_sc=has_sc)

    inputs = [x_s2d, w1] + ([ws] if has_sc else [])
    in_specs = [pl.BlockSpec((1, Hs, Ws, Cs), lambda n: (n, 0, 0, 0)),
                pl.BlockSpec(w1.shape, lambda n: (0, 0))]
    if has_sc:
        in_specs.append(pl.BlockSpec(ws.shape, lambda n: (0, 0)))

    out_shape = [jax.ShapeDtypeStruct((N, Ho, Wo, cout_p), jnp.bfloat16)]
    out_specs = [pl.BlockSpec((1, Ho, Wo, cout_p), lambda n: (n, 0, 0, 0))]
    if has_sc:
        out_shape.append(jax.ShapeDtypeStruct((N, Ho * Wo, cout_p), jnp.bfloat16))
        out_specs.append(pl.BlockSpec((1, Ho * Wo, cout_p), lambda n: (n, 0, 0)))
    out_shape.append(jax.ShapeDtypeStruct((N, 2, cout_p), jnp.float32))
    out_specs.append(pl.BlockSpec((1, 2, cout_p), lambda n: (n, 0, 0)))
    if has_sc:
        out_shape.append(jax.ShapeDtypeStruct((N, 2, cout_p), jnp.float32))
        out_specs.append(pl.BlockSpec((1, 2, cout_p), lambda n: (n, 0, 0)))

    est = (2 * (_nbytes((Hs, Ws, Cs), jnp.bfloat16)
                + _nbytes(w1.shape, jnp.bfloat16)
                + (0 if ws is None else _nbytes(ws.shape, jnp.bfloat16))
                + (2 if has_sc else 1) * _nbytes((Ho * Wo, cout_p), jnp.bfloat16)
                + 2 * _nbytes((2, cout_p), jnp.float32))
           + _nbytes((Ho * Wo, len(taps1) * cin_p), jnp.bfloat16)
           + 2 * _nbytes((Ho * Wo, cout_p), jnp.float32) + (4 << 20))

    outs = pl.pallas_call(
        kern,
        grid=(N,),
        out_shape=tuple(out_shape),
        in_specs=in_specs,
        out_specs=tuple(out_specs),
        compiler_params=_cparams(est),
    )(*inputs)

    if has_sc:
        raw1, raw_s, st1, st_s = outs
    else:
        (raw1, st1), raw_s, st_s = outs, None, None
    return raw1, raw_s, st1, st_s


# ---------------------------------------------------------------------------
# Kernel 2: BN1+ReLU fused into conv2's prologue + 3x3/stride-1 conv + BN2 stats.
# y1 never touches HBM: it is normalised into a zero-halo VMEM scratch.
# ---------------------------------------------------------------------------
def _stage2_kernel(raw1_ref, s1_ref, b1_ref, w2_ref, raw2_ref, st2_ref, ypad_ref,
                   *, Ho, Wo, cp):
    scale = s1_ref[...].reshape(1, 1, cp)
    shift = b1_ref[...].reshape(1, 1, cp)
    y = jnp.maximum(raw1_ref[0].astype(jnp.float32) * scale + shift, 0.0)
    # zero every step (not only step 0) so it stays correct if the grid is split
    # across TensorCores; halo must be exactly zero.
    ypad_ref[...] = jnp.zeros_like(ypad_ref)
    ypad_ref[1:Ho + 1, 1:Wo + 1, :] = y.astype(ypad_ref.dtype)

    def tap(ro, co):
        return ypad_ref[ro:ro + Ho, co:co + Wo, :].reshape(Ho * Wo, cp)

    patches = jnp.concatenate(
        [tap(ro, co) for ro in range(3) for co in range(3)], axis=-1)
    acc = jnp.dot(patches, w2_ref[...], preferred_element_type=jnp.float32)
    raw2_ref[0] = acc.astype(raw2_ref.dtype)                        # bf16, flat
    st2_ref[0] = jnp.concatenate(
        [jnp.sum(acc, axis=0, keepdims=True),
         jnp.sum(acc * acc, axis=0, keepdims=True)], axis=0)


def _stage2(raw1, scale1, shift1, w2, Ho, Wo, cout_p):
    N = raw1.shape[0]
    kern = functools.partial(_stage2_kernel, Ho=Ho, Wo=Wo, cp=cout_p)
    est = (2 * (_nbytes((Ho, Wo, cout_p), jnp.bfloat16)
                + _nbytes(w2.shape, jnp.bfloat16)
                + _nbytes((Ho * Wo, cout_p), jnp.bfloat16)
                + _nbytes((2, cout_p), jnp.float32))
           + _nbytes((Ho + 2, Wo + 2, cout_p), jnp.bfloat16)
           + _nbytes((Ho * Wo, 9 * cout_p), jnp.bfloat16)
           + 2 * _nbytes((Ho * Wo, cout_p), jnp.float32) + (4 << 20))
    raw2, st2 = pl.pallas_call(
        kern,
        grid=(N,),
        out_shape=(jax.ShapeDtypeStruct((N, Ho * Wo, cout_p), jnp.bfloat16),
                   jax.ShapeDtypeStruct((N, 2, cout_p), jnp.float32)),
        in_specs=[pl.BlockSpec((1, Ho, Wo, cout_p), lambda n: (n, 0, 0, 0)),
                  pl.BlockSpec((1, cout_p), lambda n: (0, 0)),
                  pl.BlockSpec((1, cout_p), lambda n: (0, 0)),
                  pl.BlockSpec(w2.shape, lambda n: (0, 0))],
        out_specs=(pl.BlockSpec((1, Ho * Wo, cout_p), lambda n: (n, 0, 0)),
                   pl.BlockSpec((1, 2, cout_p), lambda n: (n, 0, 0))),
        scratch_shapes=[pltpu.VMEM((Ho + 2, Wo + 2, cout_p), jnp.bfloat16)],
        compiler_params=_cparams(est),
    )(raw1, scale1, shift1, w2)
    return raw2, st2


# ---------------------------------------------------------------------------
# Kernel 3: BN2 apply + residual (own scale/shift, or identity) + final ReLU.
# Works on flat (Ho*Wo, Cp) tiles (lane-dense 2-D loads/stores).
# ---------------------------------------------------------------------------
def _epilogue_kernel(raw2_ref, s2_ref, b2_ref, res_ref, rs_ref, rb_ref, out_ref):
    y = raw2_ref[0].astype(jnp.float32) * s2_ref[...] + b2_ref[...]
    r = res_ref[0].astype(jnp.float32) * rs_ref[...] + rb_ref[...]
    out_ref[0] = jnp.maximum(y + r, 0.0).astype(out_ref.dtype)


def _epilogue(raw2, scale2, shift2, res, rscale, rshift, out_dtype):
    N, M1, Cp = raw2.shape
    est = (2 * (2 * _nbytes((M1, Cp), jnp.bfloat16)
                + _nbytes((M1, Cp), out_dtype)
                + 4 * _nbytes((1, Cp), jnp.float32)) + (4 << 20))
    return pl.pallas_call(
        _epilogue_kernel,
        grid=(N,),
        out_shape=jax.ShapeDtypeStruct((N, M1, Cp), out_dtype),
        in_specs=[pl.BlockSpec((1, M1, Cp), lambda n: (n, 0, 0)),
                  pl.BlockSpec((1, Cp), lambda n: (0, 0)),
                  pl.BlockSpec((1, Cp), lambda n: (0, 0)),
                  pl.BlockSpec((1, M1, Cp), lambda n: (n, 0, 0)),
                  pl.BlockSpec((1, Cp), lambda n: (0, 0)),
                  pl.BlockSpec((1, Cp), lambda n: (0, 0))],
        out_specs=pl.BlockSpec((1, M1, Cp), lambda n: (n, 0, 0)),
        compiler_params=_cparams(est),
    )(raw2, scale2, shift2, res, rscale, rshift)


# ---------------------------------------------------------------------------
# Plain-JAX glue (layout plumbing: padding, space-to-depth, BN stat folding).
# ---------------------------------------------------------------------------
def _pad_lanes(x, cp):
    c = x.shape[-1]
    if c == cp:
        return x
    return jnp.pad(x, [(0, 0)] * (x.ndim - 1) + [(0, cp - c)])


def _space_to_depth(x, s):
    """(N,H,W,C) -> (N,ceil(H/s),ceil(W/s),s*s*C); identity for s == 1."""
    if s == 1:
        return x
    N, H, W, C = x.shape
    Hp, Wp = _round_up(H, s), _round_up(W, s)
    x = jnp.pad(x, ((0, 0), (0, Hp - H), (0, Wp - W), (0, 0)))
    x = x.reshape(N, Hp // s, s, Wp // s, s, C)
    x = x.transpose(0, 1, 3, 2, 4, 5)
    return x.reshape(N, Hp // s, Wp // s, s * s * C)


def _prep_weight(w):
    """(kh,kw,Cin,Cout) -> (kh*kw*Cin_p, Cout_p) bf16 (taps folded into K)."""
    kh, kw, ci, co = w.shape
    ci_p, co_p = _round_up(ci, LANE), _round_up(co, LANE)
    w = jnp.pad(w, ((0, 0), (0, 0), (0, ci_p - ci), (0, co_p - co)))
    return w.reshape(kh * kw * ci_p, co_p).astype(jnp.bfloat16)


def _conv_taps(k, stride, base_off):
    """Static tap specs (row_off, col_off, phase) into the space-to-depth input."""
    taps = []
    for i in range(k):
        for j in range(k):
            r, c = base_off + i, base_off + j
            taps.append((r // stride, c // stride,
                         (r % stride) * stride + (c % stride)))
    return tuple(taps)


def _bn_scale_shift(stats, gamma, beta, m_total, cout, cout_p):
    """Fold accumulated (sum, sum_sq) into per-channel scale/shift (lane-padded)."""
    s1 = jnp.sum(stats[:, 0, :cout], axis=0)
    s2 = jnp.sum(stats[:, 1, :cout], axis=0)
    mean = s1 / m_total
    var = jnp.maximum(s2 / m_total - mean * mean, 0.0)
    # TODO(synk): E[x^2]-E[x]^2 in f32 can cancel for |mean|>>std; use a shifted
    # two-pass formulation if this is used for real training data.
    scale = gamma.reshape(-1) * jax.lax.rsqrt(var + BN_EPS)
    shift = beta.reshape(-1) - mean * scale
    scale = jnp.pad(scale, (0, cout_p - cout)).reshape(1, cout_p)
    shift = jnp.pad(shift, (0, cout_p - cout)).reshape(1, cout_p)
    return scale.astype(jnp.float32), shift.astype(jnp.float32)


# ---------------------------------------------------------------------------
# BasicBlock forward (conv weights stored HWIO: (kh, kw, Cin, Cout)).
# BatchNorm uses training-mode batch statistics over all N*Ho*Wo rows
# (matches the PyTorch module's forward in train mode).
# ---------------------------------------------------------------------------
def basic_block_forward(x_nchw, params, stride):
    x = jnp.transpose(x_nchw, (0, 2, 3, 1)).astype(jnp.float32)     # NCHW -> NHWC
    N, H, W, Cin = x.shape
    Cout = params["w1"].shape[-1]
    Cin_p, Cout_p = _round_up(Cin, LANE), _round_up(Cout, LANE)
    Ho = (H + 2 - 3) // stride + 1
    Wo = (W + 2 - 3) // stride + 1
    M = N * Ho * Wo
    has_sc = (stride != 1) or (Cin != Cout)

    # layout plumbing: channel-pad, bf16, spatial pad=1, space-to-depth phases.
    x_cp = _pad_lanes(x, Cin_p).astype(jnp.bfloat16)                # (N,H,W,Cin_p)
    x_pad = jnp.pad(x_cp, ((0, 0), (1, 1), (1, 1), (0, 0)))
    x_s2d = _space_to_depth(x_pad, stride)

    w1 = _prep_weight(params["w1"])                                 # (9*Cin_p, Cout_p)
    ws = _prep_weight(params["ws"]) if has_sc else None             # (Cin_p, Cout_p)
    taps1 = _conv_taps(3, stride, 0)
    tap_s = _conv_taps(1, stride, 1)[0]   # 1x1/pad0 conv == offset-1 tap of padded x

    # stage 1: conv1 + (fused) shortcut conv + per-image BN partial stats
    raw1, raw_s, st1, st_s = _stage1(x_s2d, w1, ws, taps1, tap_s,
                                     Ho, Wo, Cin_p, Cout_p)
    scale1, shift1 = _bn_scale_shift(st1, params["g1"], params["b1"], M, Cout, Cout_p)

    # stage 2: BN1+ReLU fused into conv2 prologue, conv2 + BN2 partial stats
    w2 = _prep_weight(params["w2"])                                 # (9*Cout_p, Cout_p)
    raw2, st2 = _stage2(raw1, scale1, shift1, w2, Ho, Wo, Cout_p)
    scale2, shift2 = _bn_scale_shift(st2, params["g2"], params["b2"], M, Cout, Cout_p)

    # residual path: shortcut-conv BN, or bf16 identity (scale=1, shift=0)
    if has_sc:
        rscale, rshift = _bn_scale_shift(st_s, params["gs"], params["bs"], M, Cout, Cout_p)
        res = raw_s
    else:
        rscale = jnp.pad(jnp.ones((Cout,), jnp.float32),
                         (0, Cout_p - Cout)).reshape(1, Cout_p)
        rshift = jnp.zeros((1, Cout_p), jnp.float32)
        res = x_cp.reshape(N, H * W, Cin_p)                         # free flat view, bf16

    out = _epilogue(raw2, scale2, shift2, res, rscale, rshift, jnp.float32)
    out = out.reshape(N, Ho, Wo, Cout_p)[:, :, :, :Cout]
    # TODO(synk): when chaining blocks keep bf16/NHWC/channel-padded and skip this.
    return jnp.transpose(out, (0, 3, 1, 2))                         # back to NCHW


# ---------------------------------------------------------------------------
# Pure-JAX reference (mirrors the kernel's bf16-matmul-input / f32-accumulate
# choice so the comparison isolates tap / BN-statistic / fusion correctness).
# ---------------------------------------------------------------------------
def _ref_conv(x_nhwc, w_hwio, stride, pad):
    return jax.lax.conv_general_dilated(
        x_nhwc.astype(jnp.bfloat16), w_hwio.astype(jnp.bfloat16),
        window_strides=(stride, stride),
        padding=[(pad, pad), (pad, pad)],
        dimension_numbers=("NHWC", "HWIO", "NHWC"),
        preferred_element_type=jnp.float32)


def _ref_bn(y, gamma, beta):
    mean = jnp.mean(y, axis=(0, 1, 2), keepdims=True)
    var = jnp.mean((y - mean) ** 2, axis=(0, 1, 2), keepdims=True)
    return ((y - mean) * jax.lax.rsqrt(var + BN_EPS)
            * gamma.reshape(1, 1, 1, -1) + beta.reshape(1, 1, 1, -1))


def basic_block_reference(x_nchw, params, stride):
    x = jnp.transpose(x_nchw, (0, 2, 3, 1)).astype(jnp.float32)
    Cin, Cout = x.shape[-1], params["w1"].shape[-1]
    y1 = jnp.maximum(
        _ref_bn(_ref_conv(x, params["w1"], stride, 1), params["g1"], params["b1"]), 0.0)
    y2 = _ref_bn(_ref_conv(y1, params["w2"], 1, 1), params["g2"], params["b2"])
    if stride != 1 or Cin != Cout:
        sc = _ref_bn(_ref_conv(x, params["ws"], stride, 0), params["gs"], params["bs"])
    else:
        sc = x
    out = jnp.maximum(y2 + sc, 0.0)
    return jnp.transpose(out, (0, 3, 1, 2))


# ---------------------------------------------------------------------------
if __name__ == "__main__":
    key = jax.random.PRNGKey(0)

    def make_params(k, cin, cout, with_sc):
        ks = jax.random.split(k, 3)
        p = {
            "w1": 0.1 * jax.random.normal(ks[0], (3, 3, cin, cout), jnp.float32),
            "w2": 0.1 * jax.random.normal(ks[1], (3, 3, cout, cout), jnp.float32),
            "g1": jnp.ones((cout,), jnp.float32), "b1": jnp.zeros((cout,), jnp.float32),
            "g2": jnp.ones((cout,), jnp.float32), "b2": jnp.zeros((cout,), jnp.float32),
        }
        if with_sc:
            p["ws"] = 0.1 * jax.random.normal(ks[2], (1, 1, cin, cout), jnp.float32)
            p["gs"] = jnp.ones((cout,), jnp.float32)
            p["bs"] = jnp.zeros((cout,), jnp.float32)
        return p

    k1, k2, kx1, kx2 = jax.random.split(key, 4)

    # Downsampling block: stride=2, Cin != Cout (conv shortcut path).
    N, Cin, H, W, Cout, stride = 2, 4, 16, 16, 8, 2
    params = make_params(k1, Cin, Cout, True)
    x = jax.random.normal(kx1, (N, Cin, H, W), jnp.float32)          # NCHW like PyTorch
    out = jax.block_until_ready(basic_block_forward(x, params, stride))
    ref = jax.block_until_ready(basic_block_reference(x, params, stride))
    assert out.shape == (N, Cout, H // stride, W // stride), out.shape
    assert jnp.allclose(out, ref, rtol=2e-2, atol=2e-2), float(jnp.abs(out - ref).max())

    # Identity-shortcut block: stride=1, Cin == Cout.
    params_id = make_params(k2, Cout, Cout, False)
    x2 = jax.random.normal(kx2, (N, Cout, H, W), jnp.float32)
    out2 = jax.block_until_ready(basic_block_forward(x2, params_id, 1))
    ref2 = jax.block_until_ready(basic_block_reference(x2, params_id, 1))
    assert out2.shape == (N, Cout, H, W), out2.shape
    assert jnp.allclose(out2, ref2, rtol=2e-2, atol=2e-2), float(jnp.abs(out2 - ref2).max())

    print("KERNEL_OK")
</pallas_src>

<mosaic_0001>
module attributes {stable_mosaic.version = 11 : i64} {
  func.func @_stage1_kernel(%arg0: i32, %arg1: memref<1x9x9x512xbf16, #tpu.memory_space<vmem>>, %arg2: memref<1152x128xbf16, #tpu.memory_space<vmem>>, %arg3: memref<128x128xbf16, #tpu.memory_space<vmem>>, %arg4: memref<1x8x8x128xbf16, #tpu.memory_space<vmem>>, %arg5: memref<1x64x128xbf16, #tpu.memory_space<vmem>>, %arg6: memref<1x2x128xf32, #tpu.memory_space<vmem>>, %arg7: memref<1x2x128xf32, #tpu.memory_space<vmem>>) attributes {dimension_semantics = [#tpu.dimension_semantics<parallel>], iteration_bounds = array<i64: 2>, scalar_prefetch = 0 : i64, scratch_operands = 0 : i64, tpu.core_type = #tpu.core_type<tc>, window_params = [{transform_indices = @transform_0, window_bounds = array<i64: 1, 9, 9, 512>}, {pipeline_mode = #tpu.pipeline_mode<synchronous>, transform_indices = @transform_1, window_bounds = array<i64: 1152, 128>}, {pipeline_mode = #tpu.pipeline_mode<synchronous>, transform_indices = @transform_2, window_bounds = array<i64: 128, 128>}, {transform_indices = @transform_3, window_bounds = array<i64: 1, 8, 8, 128>}, {transform_indices = @transform_4, window_bounds = array<i64: 1, 64, 128>}, {transform_indices = @transform_5, window_bounds = array<i64: 1, 2, 128>}, {transform_indices = @transform_6, window_bounds = array<i64: 1, 2, 128>}]} {
    %c0 = arith.constant 0 : index
    %c0_0 = arith.constant 0 : index
    %c0_1 = arith.constant 0 : index
    %c0_2 = arith.constant 0 : index
    %0 = vector.load %arg1[%c0, %c0_0, %c0_1, %c0_2] : memref<1x9x9x512xbf16, #tpu.memory_space<vmem>>, vector<1x9x9x512xbf16>
    %1 = vector.shape_cast %0 : vector<1x9x9x512xbf16> to vector<9x9x512xbf16>
    %2 = vector.extract_strided_slice %1 {offsets = [0, 0, 0], sizes = [8, 8, 128], strides = [1, 1, 1]} : vector<9x9x512xbf16> to vector<8x8x128xbf16>
    %3 = vector.shape_cast %2 : vector<8x8x128xbf16> to vector<64x128xbf16>
    %4 = vector.extract_strided_slice %1 {offsets = [0, 0, 128], sizes = [8, 8, 128], strides = [1, 1, 1]} : vector<9x9x512xbf16> to vector<8x8x128xbf16>
    %5 = vector.shape_cast %4 : vector<8x8x128xbf16> to vector<64x128xbf16>
    %6 = vector.extract_strided_slice %1 {offsets = [0, 1, 0], sizes = [8, 8, 128], strides = [1, 1, 1]} : vector<9x9x512xbf16> to vector<8x8x128xbf16>
    %7 = vector.shape_cast %6 : vector<8x8x128xbf16> to vector<64x128xbf16>
    %8 = vector.extract_strided_slice %1 {offsets = [0, 0, 256], sizes = [8, 8, 128], strides = [1, 1, 1]} : vector<9x9x512xbf16> to vector<8x8x128xbf16>
    %9 = vector.shape_cast %8 : vector<8x8x128xbf16> to vector<64x128xbf16>
    %10 = vector.extract_strided_slice %1 {offsets = [0, 0, 384], sizes = [8, 8, 128], strides = [1, 1, 1]} : vector<9x9x512xbf16> to vector<8x8x128xbf16>
    %11 = vector.shape_cast %10 : vector<8x8x128xbf16> to vector<64x128xbf16>
    %12 = vector.extract_strided_slice %1 {offsets = [0, 1, 256], sizes = [8, 8, 128], strides = [1, 1, 1]} : vector<9x9x512xbf16> to vector<8x8x128xbf16>
    %13 = vector.shape_cast %12 : vector<8x8x128xbf16> to vector<64x128xbf16>
    %14 = vector.extract_strided_slice %1 {offsets = [1, 0, 0], sizes = [8, 8, 128], strides = [1, 1, 1]} : vector<9x9x512xbf16> to vector<8x8x128xbf16>
    %15 = vector.shape_cast %14 : vector<8x8x128xbf16> to vector<64x128xbf16>
    %16 = vector.extract_strided_slice %1 {offsets = [1, 0, 128], sizes = [8, 8, 128], strides = [1, 1, 1]} : vector<9x9x512xbf16> to vector<8x8x128xbf16>
    %17 = vector.shape_cast %16 : vector<8x8x128xbf16> to vector<64x128xbf16>
    %18 = vector.extract_strided_slice %1 {offsets = [1, 1, 0], sizes = [8, 8, 128], strides = [1, 1, 1]} : vector<9x9x512xbf16> to vector<8x8x128xbf16>
    %19 = vector.shape_cast %18 : vector<8x8x128xbf16> to vector<64x128xbf16>
    %20 = tpu.concatenate %3, %5, %7, %9, %11, %13, %15, %17, %19 in 1 : vector<64x128xbf16>, vector<64x128xbf16>, vector<64x128xbf16>, vector<64x128xbf16>, vector<64x128xbf16>, vector<64x128xbf16>, vector<64x128xbf16>, vector<64x128xbf16>, vector<64x128xbf16> -> vector<64x1152xbf16>
    %c0_3 = arith.constant 0 : index
    %c0_4 = arith.constant 0 : index
    %21 = vector.load %arg2[%c0_3, %c0_4] : memref<1152x128xbf16, #tpu.memory_space<vmem>>, vector<1152x128xbf16>
    %cst = arith.constant dense<0.000000e+00> : vector<64x128xf32>
    %22 = tpu.matmul %20, %21, %cst {dimension_numbers = #tpu.dot_dimension_numbers<[1], [0], [0], [1], [0, 0, 1, 1], [], []>} : vector<64x1152xbf16>, vector<1152x128xbf16>, vector<64x128xf32> -> vector<64x128xf32>
    %23 = vector.shape_cast %22 : vector<64x128xf32> to vector<8x8x128xf32>
    %24 = arith.truncf %23 : vector<8x8x128xf32> to vector<8x8x128xbf16>
    %c0_5 = arith.constant 0 : index
    %c0_6 = arith.constant 0 : index
    %c0_7 = arith.constant 0 : index
    %c0_8 = arith.constant 0 : index
    %25 = vector.load %arg4[%c0_5, %c0_6, %c0_7, %c0_8] : memref<1x8x8x128xbf16, #tpu.memory_space<vmem>>, vector<1x8x8x128xbf16>
    %26 = vector.shape_cast %25 : vector<1x8x8x128xbf16> to vector<8x8x128xbf16>
    %27 = vector.shape_cast %24 : vector<8x8x128xbf16> to vector<1x8x8x128xbf16>
    tpu.vector_store %arg4[%c0_5, %c0_6, %c0_7, %c0_8], %27 {strides = array<i32>} : memref<1x8x8x128xbf16, #tpu.memory_space<vmem>>, vector<1x8x8x128xbf16>,
    %cst_9 = arith.constant dense<0.000000e+00> : vector<128xf32>
    %28 = vector.multi_reduction <add>, %22, %cst_9 [0] : vector<64x128xf32> to vector<128xf32>
    %29 = vector.shape_cast %28 : vector<128xf32> to vector<1x128xf32>
    %30 = arith.mulf %22, %22 : vector<64x128xf32>
    %cst_10 = arith.constant dense<0.000000e+00> : vector<128xf32>
    %31 = vector.multi_reduction <add>, %30, %cst_10 [0] : vector<64x128xf32> to vector<128xf32>
    %32 = vector.shape_cast %31 : vector<128xf32> to vector<1x128xf32>
    %33 = tpu.concatenate %29, %32 in 0 : vector<1x128xf32>, vector<1x128xf32> -> vector<2x128xf32>
    %c0_11 = arith.constant 0 : index
    %c0_12 = arith.constant 0 : index
    %c0_13 = arith.constant 0 : index
    %34 = vector.load %arg6[%c0_11, %c0_12, %c0_13] : memref<1x2x128xf32, #tpu.memory_space<vmem>>, vector<1x2x128xf32>
    %35 = vector.shape_cast %34 : vector<1x2x128xf32> to vector<2x128xf32>
    %36 = vector.shape_cast %33 : vector<2x128xf32> to vector<1x2x128xf32>
    tpu.vector_store %arg6[%c0_11, %c0_12, %c0_13], %36 {strides = array<i32>} : memref<1x2x128xf32, #tpu.memory_space<vmem>>, vector<1x2x128xf32>,
    %37 = vector.extract_strided_slice %1 {offsets = [0, 0, 384], sizes = [8, 8, 128], strides = [1, 1, 1]} : vector<9x9x512xbf16> to vector<8x8x128xbf16>
    %38 = vector.shape_cast %37 : vector<8x8x128xbf16> to vector<64x128xbf16>
    %c0_14 = arith.constant 0 : index
    %c0_15 = arith.constant 0 : index
    %39 = vector.load %arg3[%c0_14, %c0_15] : memref<128x128xbf16, #tpu.memory_space<vmem>>, vector<128x128xbf16>
    %cst_16 = arith.constant dense<0.000000e+00> : vector<64x128xf32>
    %40 = tpu.matmul %38, %39, %cst_16 {dimension_numbers = #tpu.dot_dimension_numbers<[1], [0], [0], [1], [0, 0, 1, 1], [], []>} : vector<64x128xbf16>, vector<128x128xbf16>, vector<64x128xf32> -> vector<64x128xf32>
    %41 = arith.truncf %40 : vector<64x128xf32> to vector<64x128xbf16>
    %c0_17 = arith.constant 0 : index
    %c0_18 = arith.constant 0 : index
    %c0_19 = arith.constant 0 : index
    %42 = vector.load %arg5[%c0_17, %c0_18, %c0_19] : memref<1x64x128xbf16, #tpu.memory_space<vmem>>, vector<1x64x128xbf16>
    %43 = vector.shape_cast %42 : vector<1x64x128xbf16> to vector<64x128xbf16>
    %44 = vector.shape_cast %41 : vector<64x128xbf16> to vector<1x64x128xbf16>
    tpu.vector_store %arg5[%c0_17, %c0_18, %c0_19], %44 {strides = array<i32>} : memref<1x64x128xbf16, #tpu.memory_space<vmem>>, vector<1x64x128xbf16>,
    %cst_20 = arith.constant dense<0.000000e+00> : vector<128xf32>
    %45 = vector.multi_reduction <add>, %40, %cst_20 [0] : vector<64x128xf32> to vector<128xf32>
    %46 = vector.shape_cast %45 : vector<128xf32> to vector<1x128xf32>
    %47 = arith.mulf %40, %40 : vector<64x128xf32>
    %cst_21 = arith.constant dense<0.000000e+00> : vector<128xf32>
    %48 = vector.multi_reduction <add>, %47, %cst_21 [0] : vector<64x128xf32> to vector<128xf32>
    %49 = vector.shape_cast %48 : vector<128xf32> to vector<1x128xf32>
    %50 = tpu.concatenate %46, %49 in 0 : vector<1x128xf32>, vector<1x128xf32> -> vector<2x128xf32>
    %c0_22 = arith.constant 0 : index
    %c0_23 = arith.constant 0 : index
    %c0_24 = arith.constant 0 : index
    %51 = vector.load %arg7[%c0_22, %c0_23, %c0_24] : memref<1x2x128xf32, #tpu.memory_space<vmem>>, vector<1x2x128xf32>
    %52 = vector.shape_cast %51 : vector<1x2x128xf32> to vector<2x128xf32>
    %53 = vector.shape_cast %50 : vector<2x128xf32> to vector<1x2x128xf32>
    tpu.vector_store %arg7[%c0_22, %c0_23, %c0_24], %53 {strides = array<i32>} : memref<1x2x128xf32, #tpu.memory_space<vmem>>, vector<1x2x128xf32>,
    return
  }
  func.func @transform_0(%arg0: i32) -> (i32, i32, i32, i32) {
    %c0_i32 = arith.constant 0 : i32
    %c0_i32_0 = arith.constant 0 : i32
    %c0_i32_1 = arith.constant 0 : i32
    %c0_i32_2 = arith.constant 0 : i32
    return %arg0, %c0_i32, %c0_i32_0, %c0_i32_1 : i32, i32, i32, i32
  }
  func.func @transform_1(%arg0: i32) -> (i32, i32) {
    %c0_i32 = arith.constant 0 : i32
    %c0_i32_0 = arith.constant 0 : i32
    %c0_i32_1 = arith.constant 0 : i32
    return %c0_i32, %c0_i32_0 : i32, i32
  }
  func.func @transform_2(%arg0: i32) -> (i32, i32) {
    %c0_i32 = arith.constant 0 : i32
    %c0_i32_0 = arith.constant 0 : i32
    %c0_i32_1 = arith.constant 0 : i32
    return %c0_i32, %c0_i32_0 : i32, i32
  }
  func.func @transform_3(%arg0: i32) -> (i32, i32, i32, i32) {
    %c0_i32 = arith.constant 0 : i32
    %c0_i32_0 = arith.constant 0 : i32
    %c0_i32_1 = arith.constant 0 : i32
    %c0_i32_2 = arith.constant 0 : i32
    return %arg0, %c0_i32, %c0_i32_0, %c0_i32_1 : i32, i32, i32, i32
  }
  func.func @transform_4(%arg0: i32) -> (i32, i32, i32) {
    %c0_i32 = arith.constant 0 : i32
    %c0_i32_0 = arith.constant 0 : i32
    %c0_i32_1 = arith.constant 0 : i32
    return %arg0, %c0_i32, %c0_i32_0 : i32, i32, i32
  }
  func.func @transform_5(%arg0: i32) -> (i32, i32, i32) {
    %c0_i32 = arith.constant 0 : i32
    %c0_i32_0 = arith.constant 0 : i32
    %c0_i32_1 = arith.constant 0 : i32
    return %arg0, %c0_i32, %c0_i32_0 : i32, i32, i32
  }
  func.func @transform_6(%arg0: i32) -> (i32, i32, i32) {
    %c0_i32 = arith.constant 0 : i32
    %c0_i32_0 = arith.constant 0 : i32
    %c0_i32_1 = arith.constant 0 : i32
    return %arg0, %c0_i32, %c0_i32_0 : i32, i32, i32
  }
}

</mosaic_0001>

<bundles_post_ra>
// kernel: tpu_custom_call.1
= control target key start
LH: loop header
LB: loop body
LE: loop exit
PB: predicated region body
PF: predicated region fallthrough
CT: control target
= control target key end

     0   :  { %s3639_s0 = inlined_call_operand.vmem [shape: bf16[2,9,9,512], index: 0, kind: input, shape index: {}]   ;;  %s3640_s1 = inlined_call_operand.vmem [shape: bf16[1152,128], index: 1, kind: input, shape index: {}]   ;;  %s3641_s2 = inlined_call_operand.vmem [shape: bf16[128,128], index: 2, kind: input, shape index: {}]   ;;  %s3642_s3 = inlined_call_operand.hbm [shape: bf16[2,8,8,128], index: 3, kind: output, shape index: {0}]   ;;  %s3643_s4 = inlined_call_operand.hbm [shape: bf16[2,64,128], index: 4, kind: output, shape index: {1}]   ;;  %s3644_s5 = inlined_call_operand.hbm [shape: f32[2,2,128], index: 5, kind: output, shape index: {2}]   ;;  %s3645_s6 = inlined_call_operand.hbm [shape: f32[2,2,128], index: 6, kind: output, shape index: {3}]  }
   0x1   :  { %3647 = sst [smem:[#allocation23_spill]] %s3639_s0 }
   0x2   :  { %12 = vsyncpa [#allocation3], 0 }
   0x3   :  { %14 = vsyncpa [#allocation3 + $0x1], 0 }
   0x4   :  { %15 = vsyncpa [#allocation5], 0 }
   0x5   :  { %17 = vsyncpa [#allocation5 + $0x1], 0 }
   0x6   :  { %18 = vsyncpa [#allocation8], 0 }
   0x7   :  { %20 = vsyncpa [#allocation8 + $0x1], 0  ;;  %s2855_s21 = smov 0   ;;  %s2857_s22 = smov 0  }
   0x8   :  { %s2859_s23 = smov 0   ;;  %s2861_s24 = smov 0  }
   0x9 LB: > { %s2876_s25 = sadd.s32 4294967295, %s2812_s24   ;;  %s3646_s26 = sadd.s32 4294967294, %s2812_s24   ;;  %s2812_s24 = sphi %s2861_s24, %s3679_s24   ;;  %s2808_s23 = sphi %s2859_s23, %s3678_s23   ;;  %s2804_s22 = sphi %s2857_s22, %s3677_s22   ;;  %s2800_s21 = sphi %s2855_s21, %s3676_s21  }
   0xa   : > { %s2880_s27 = sadd.s32 1, %s2812_s24   ;;  %s101_s28 = sadd.s32 1, %s2808_s23 }
   0xb   : > { %s98_s29 = ssub.s32 %s2812_s24, %s2880_s27  ;;  %p111_p0 = scmp.ne.s32.totalorder %s2808_s23, %s2804_s22 }
   0xc   : > { %p99_p1 = scmp.eq.s32.totalorder %s98_s29, 0  ;;  %p112_p2 = scmp.eq.s32.totalorder %s2876_s25, 1 }
   0xd   : > { %p117_p3 = scmp.ne.s32.totalorder %s2804_s22, %s2800_s21  ;;  %p118_p4 = scmp.eq.s32.totalorder %s3646_s26, 1 }
   0xe   : > { %s2893_s30 = scalar_select %p99_p1, %s2808_s23, %s101_s28  }
   0xf   : > { %p2895_p5 = por %p112_p2, %p111_p0  ;;  %p2899_p6 = por %p118_p4, %p117_p3 }
  0x10   : > { %p2099_p7 = scmp.ge.s32.totalorder %s2812_s24, 1  ;;  %p228_p8 = scmp.lt.s32.totalorder %s2812_s24, 3 }
  0x12   : > { %p229_p9 = pnand %p2099_p7, %p228_p8 }
  0x14   : > { %232 = sbr.rel (%p229_p9) target bundleno = 431 (0x1af), region = 32 }
  0x19   : > { %v2586_v0 = vld [vmem:[%s3640_s1 + $0x78] sm:$0xff]   ;;  %v2590_v4 = vld [vmem:[%s3640_s1 + $0x70] sm:$0xff]   ;;  %v2594_v8 = vld [vmem:[%s3640_s1 + $0x68] sm:$0xff]   ;;  %p273_p10 = scmp.lt.s32.totalorder %s2876_s25, 1  ;;  %s3650_s0 = sld [smem:[#allocation23_spill]] }
  0x1a   : > { %v2587_v1 = vld [vmem:[%s3640_s1 + $0xf8] sm:$0xff]   ;;  %2297 = vmatprep.subr.bf16.mxu0 %v2586_v0  ;;  %v2591_v5 = vld [vmem:[%s3640_s1 + $0xf0] sm:$0xff]   ;;  %v2595_v9 = vld [vmem:[%s3640_s1 + $0xe8] sm:$0xff]   ;;  %vm329_vm0 = vsmask.f32 3328  ;;  %s1875_s18 = sand.u32 1, %s2876_s25  }
  0x1b   : > { %v2588_v2 = vld [vmem:[%s3640_s1 + $0x38] sm:$0xff]   ;;  %2337 = vmatprep.subr.bf16.mxu1 %v2587_v1  ;;  %v2592_v6 = vld [vmem:[%s3640_s1 + $0x30] sm:$0xff]   ;;  %v2596_v10 = vld [vmem:[%s3640_s1 + $0x28] sm:$0xff]   ;;  %s274_s11 = scalar_select %p273_p10, %s2876_s25, 1  ;;  %vm330_vm1 = vsmask.f32 7440 }
  0x1c   : > { %v2589_v3 = vld [vmem:[%s3640_s1 + $0xb8] sm:$0xff]   ;;  %2298 = vmatpush3.bf16.msra.mxu0 %v2588_v2  ;;  %v2593_v7 = vld [vmem:[%s3640_s1 + $0xb0] sm:$0xff]   ;;  %v2597_v11 = vld [vmem:[%s3640_s1 + $0xa8] sm:$0xff]   ;;  %s2249_s19 = sshll.u32 %s2876_s25, 9 }
  0x1d   : > { %2338 = vmatpush3.bf16.msra.mxu1 %v2589_v3  ;;  %2299 = vmatprep.subr.bf16.mxu0 %v2590_v4  ;;  %v2598_v12 = vld [vmem:[%s3640_s1 + $0x60] sm:$0xff]   ;;  %v2602_v16 = vld [vmem:[%s3640_s1 + $0x58] sm:$0xff]   ;;  %v2606_v20 = vld [vmem:[%s3640_s1 + $0x50] sm:$0xff]   ;;  %s2529_s20 = smul.u32 288, %s274_s11  ;;  %s3488_s9 = scalar_lea.hbm %s3643_s4, %s2249_s19 }
  0x1e   : > { %2339 = vmatprep.subr.bf16.mxu1 %v2591_v5  ;;  %v2599_v13 = vld [vmem:[%s3640_s1 + $0xe0] sm:$0xff]   ;;  %v2603_v17 = vld [vmem:[%s3640_s1 + $0xd8] sm:$0xff]   ;;  %v2607_v21 = vld [vmem:[%s3640_s1 + $0xd0] sm:$0xff]   ;;  %s3496_s13 = scalar_lea.hbm %s3642_s3, %s2249_s19 }
  0x1f   : > { %v2600_v14 = vld [vmem:[%s3640_s1 + $0x20] sm:$0xff]   ;;  %v2604_v18 = vld [vmem:[%s3640_s1 + $0x18] sm:$0xff]   ;;  %v2608_v22 = vld [vmem:[%s3640_s1 + $0x10] sm:$0xff]   ;;  %s3000_s17 = scalar_lea.vmem %s3650_s0, %s2529_s20  ;;  %s2814_s20 = smov [#allocation4]  }
  0x20   : > { %2300 = vmatpush3.bf16.msra.mxu0 %v2592_v6  ;;  %v2601_v15 = vld [vmem:[%s3640_s1 + $0xa0] sm:$0xff]   ;;  %v2605_v19 = vld [vmem:[%s3640_s1 + $0x98] sm:$0xff]   ;;  %v2609_v23 = vld [vmem:[%s3640_s1 + $0x90] sm:$0xff]  }
  0x21   : > { %2340 = vmatpush3.bf16.msra.mxu1 %v2593_v7  ;;  %2301 = vmatprep.subr.bf16.mxu0 %v2594_v8  ;;  %v2610_v24 = vld [vmem:[%s3640_s1 + $0x48] sm:$0xff]   ;;  %v2614_v28 = vld [vmem:[%s3640_s1 + $0x40] sm:$0xff]   ;;  %v2618_v40 = vld [vmem:[%s3640_s1 + $0x178] sm:$0xff]  }
  0x22   : > { %2341 = vmatprep.subr.bf16.mxu1 %v2595_v9  ;;  %v2611_v25 = vld [vmem:[%s3640_s1 + $0xc8] sm:$0xff]   ;;  %v2615_v29 = vld [vmem:[%s3640_s1 + $0xc0] sm:$0xff]   ;;  %v281_v44 = vld [vmem:[%s3000_s17 + $0x10] sm:$0x11] }
  0x23   : > { %v2612_v26 = vld [vmem:[%s3640_s1 + $0x8] sm:$0xff]   ;;  %v2616_v30 = vld [vmem:[%s3640_s1] sm:$0xff]   ;;  %v2619_v45 = vld [vmem:[%s3640_s1 + $0x1f8] sm:$0xff]   ;;  %v342_v55 = vshll.u32 %v281_v44, 16 }
  0x24   : > { %2302 = vmatpush3.bf16.msra.mxu0 %v2596_v10  ;;  %v2613_v27 = vld [vmem:[%s3640_s1 + $0x88] sm:$0xff]   ;;  %v2617_v31 = vld [vmem:[%s3640_s1 + $0x80] sm:$0xff]   ;;  %v285_v48 = vld [vmem:[%s3000_s17 + $0x30] sm:$0x11] }
  0x25   : > { %2342 = vmatpush3.bf16.msra.mxu1 %v2597_v11  ;;  %2303 = vmatprep.subr.bf16.mxu0 %v2598_v12  ;;  %v279_v32 = vld [vmem:[%s3000_s17] sm:$0xff]  ;;  %v3013_v34 = vld [vmem:[%s3000_s17 + $0x8] sm:$0xff]  ;;  %v2620_v49 = vld [vmem:[%s3640_s1 + $0x138] sm:$0xff]   ;;  %v356_v59 = vshll.u32 %v285_v48, 16  ;;  %v344_v62 = vrot.slane %v342_v55, 5 }
  0x26   : > { %2343 = vmatprep.subr.bf16.mxu1 %v2599_v13  ;;  %v3010_v33 = vld [vmem:[%s3000_s17 + $0x20] sm:$0xff]  ;;  %v321_v35 = vrot.slane %v279_v32, 4  ;;  %v333_v37 = vshrl.u32 %v279_v32, 16  ;;  %v336_v38 = vshll.u32 %v279_v32, 16  ;;  %v3017_v39 = vld [vmem:[%s3000_s17 + $0x28] sm:$0xff]  ;;  %v452_v46 = vrot.slane %v3013_v34, 4  ;;  %vm3047_vm2 = vmor %vm329_vm0, %vm330_vm1 }
  0x27   : > { %v322_v36 = vrot.slane %v3010_v33, 4  ;;  %v2117_v47 = vcombine.low %v3013_v34, %v3017_v39  ;;  %v461_v50 = vshrl.u32 %v3013_v34, 16  ;;  %v464_v51 = vshll.u32 %v3013_v34, 16  ;;  %v2622_v57 = vld [vmem:[%s3640_s1 + $0x170] sm:$0xff]   ;;  %v3062_v10 = vld [vmem:[%s3000_s17 + $0x40] sm:$0xff]  ;;  %v2628_v48 = vld [vmem:[%s3640_s1 + $0x128] sm:$0xff]  }
  0x28   : > { %2304 = vmatpush3.bf16.msra.mxu0 %v2600_v14  ;;  %v335_v41 = vrot.slane %v333_v37, 4  ;;  %v338_v42 = vrot.slane %v336_v38, 5  ;;  %v2105_v52 = vcombine.low %v279_v32, %v3010_v33  ;;  %v475_v53 = vshrl.u32 %v3017_v39, 16  ;;  %v2624_v5 = vld [vmem:[%s3640_s1 + $0x130] sm:$0xff]   ;;  %v3065_v11 = vld [vmem:[%s3000_s17 + $0x60] sm:$0xff]  ;;  %v3070_v14 = vld [vmem:[%s3000_s17 + $0x48] sm:$0xff] }
  0x29   : > { %2344 = vmatpush3.bf16.msra.mxu1 %v2601_v15  ;;  %2305 = vmatprep.subr.bf16.mxu0 %v2602_v16  ;;  %v2109_v43 = vcombine.low %v321_v35, %v322_v36  ;;  %v347_v56 = vshrl.u32 %v3010_v33, 16  ;;  %v350_v58 = vshll.u32 %v3010_v33, 16  ;;  %v478_v60 = vshll.u32 %v3017_v39, 16  ;;  %v3073_v15 = vld [vmem:[%s3000_s17 + $0x68] sm:$0xff]  ;;  %v289_v16 = vld [vmem:[%s3000_s17 + $0x50] sm:$0x11] }
  0x2a   : > { %2345 = vmatprep.subr.bf16.mxu1 %v2603_v17  ;;  %1384 = vmatprep.mubr.bf16.mxu1 %v2117_v47  ;;  %v339_v54 = vor.u32 %v338_v42, %v335_v41  ;;  %v358_v2 = vrot.slane %v356_v59, 5  ;;  %v453_v4 = vrot.slane %v3017_v39, 4  ;;  %v3055_v6 = vrot.slane %v461_v50, 4  ;;  %v2627_v47 = vld [vmem:[%s3640_s1 + $0x1e8] sm:$0xff]   ;;  %v2630_v55 = vld [vmem:[%s3640_s1 + $0x160] sm:$0xff]  }
  0x2b   : > { %1319 = vmatprep.mubr.bf16.mxu0 %v2109_v43  ;;  %v349_v63 = vrot.slane %v347_v56, 4  ;;  %v352_v1 = vrot.slane %v350_v58, 5  ;;  %v3057_v7 = vrot.slane %v464_v51, 5  ;;  %v323_v12 = vrot.slane %v3062_v10, 4  ;;  %v2629_v50 = vld [vmem:[%s3640_s1 + $0x1a8] sm:$0xff]   ;;  %v2632_v59 = vld [vmem:[%s3640_s1 + $0x120] sm:$0xff]  }
  0x2c   : > { %2306 = vmatpush3.bf16.msra.mxu0 %v2604_v18  ;;  %v340_v61 = vrot.slane %v339_v54, 4  ;;  %v324_v13 = vrot.slane %v3065_v11, 4  ;;  %v477_v17 = vrot.slane %v475_v53, 4  ;;  %v480_v18 = vrot.slane %v478_v60, 5  ;;  %v290_v39 = vld [vmem:[%s3000_s17 + $0x58] sm:$0x11] }
  0x2d   : > { %2346 = vmatpush3.bf16.msra.mxu1 %v2605_v19  ;;  %2307 = vmatprep.subr.bf16.mxu0 %v2606_v20  ;;  %v353_v3 = vor.u32 %v352_v1, %v349_v63  ;;  %v2621_v20 = vld [vmem:[%s3640_s1 + $0x1b8] sm:$0xff]   ;;  %v370_v32 = vshll.u32 %v289_v16, 16  ;;  %v375_v35 = vshrl.u32 %v3065_v11, 16  ;;  %v378_v37 = vshll.u32 %v3065_v11, 16  ;;  %v3137_v63 = vld [vmem:[%s3000_s17 + $0xa0] sm:$0xff] }
  0x2e   : > { %2347 = vmatprep.subr.bf16.mxu1 %v2607_v21  ;;  %v345_v8 = vsel %vm3047_vm2, %v340_v61, %v344_v62  ;;  %v2106_v21 = vcombine.low %v3062_v10, %v3065_v11  ;;  %v467_v51 = vor.u32 %v3057_v7, %v3055_v6  ;;  %v503_v60 = vshrl.u32 %v3073_v15, 16  ;;  %v3134_v62 = vld [vmem:[%s3000_s17 + $0x80] sm:$0xff]  ;;  %v3150_v7 = vld [vmem:[%s3000_s17 + $0x88] sm:$0xff] }
  0x2f   : > { %v354_v9 = vrot.slane %v353_v3, 4  ;;  %v377_v43 = vrot.slane %v375_v35, 4  ;;  %v372_v44 = vrot.slane %v370_v32, 5  ;;  %v326_v6 = vrot.slane %v3137_v63, 4 }
  0x30   : > { %2308 = vmatpush3.bf16.msra.mxu0 %v2608_v22  ;;  %v293_v22 = vld [vmem:[%s3000_s17 + $0x70] sm:$0x11]  ;;  %v3139_v1 = vrot.slane %v467_v51, 4  ;;  %v506_v16 = vshll.u32 %v3073_v15, 16 }
  0x31   : > { %2348 = vmatpush3.bf16.msra.mxu1 %v2609_v23  ;;  %2309 = vmatprep.subr.bf16.mxu0 %v2610_v24  ;;  %v3078_v19 = vsel %vm3047_vm2, %v354_v9, %v358_v2  ;;  %v2626_v23 = vld [vmem:[%s3640_s1 + $0x168] sm:$0xff]   ;;  %v384_v38 = vshll.u32 %v293_v22, 16  ;;  %v297_v9 = vld [vmem:[%s3000_s17 + $0x90] sm:$0x11]  ;;  %v2634_v22 = vld [vmem:[%s3640_s1 + $0x158] sm:$0xff]  }
  0x32   : > { %2349 = vmatprep.subr.bf16.mxu1 %v2611_v25  ;;  %v2113_v24 = vcombine.low %v345_v8, %v3078_v19  ;;  %v2623_v25 = vld [vmem:[%s3640_s1 + $0x1f0] sm:$0xff]   ;;  %v3153_v8 = vld [vmem:[%s3000_s17 + $0xa8] sm:$0xff] }
  0x33   : > { %v386_v54 = vrot.slane %v384_v38, 5  ;;  %v2636_v38 = vld [vmem:[%s3640_s1 + $0x118] sm:$0xff]  }
  0x34   : > { %2310 = vmatpush3.bf16.msra.mxu0 %v2612_v26  ;;  %v2110_v26 = vcombine.low %v323_v12, %v324_v13 }
  0x35   : > { %2350 = vmatpush3.bf16.msra.mxu1 %v2613_v27  ;;  %2311 = vmatprep.subr.bf16.mxu0 %v2614_v28  ;;  %v489_v27 = vshrl.u32 %v3070_v14, 16  ;;  %v2118_v28 = vcombine.low %v3070_v14, %v3073_v15 }
  0x36   : > { %2351 = vmatprep.subr.bf16.mxu1 %v2615_v29  ;;  %v2625_v29 = vld [vmem:[%s3640_s1 + $0x1b0] sm:$0xff]  }
  0x38   : > { %2312 = vmatpush3.bf16.msra.mxu0 %v2616_v30  ;;  %v361_v30 = vshrl.u32 %v3062_v10, 16 }
  0x39   : > { %2352 = vmatpush3.bf16.msra.mxu1 %v2617_v31  ;;  %2377 = vmatprep.subr.bf16.mxu0 %v2618_v40  ;;  %v364_v31 = vshll.u32 %v3062_v10, 16  ;;  %v492_v40 = vshll.u32 %v3070_v14, 16 }
  0x3a   : > { %2417 = vmatprep.subr.bf16.mxu1 %v2619_v45  ;;  %v363_v41 = vrot.slane %v361_v30, 4  ;;  %v380_v45 = vrot.slane %v378_v37, 5  ;;  %v398_v30 = vshll.u32 %v297_v9, 16  ;;  %v2635_v37 = vld [vmem:[%s3640_s1 + $0x1d8] sm:$0xff]   ;;  %v3212_v9 = vld [vmem:[%s3000_s17 + $0xe0] sm:$0xff] }
  0x3b   : > { %1320 = vmatmul.mubr.bf16.vlgmr.msra.gmra.mxu0 %v2105_v52  ;;  %v366_v42 = vrot.slane %v364_v31, 5  ;;  %v481_v52 = vor.u32 %v480_v18, %v477_v17  ;;  %v2633_v18 = vld [vmem:[%s3640_s1 + $0x1a0] sm:$0xff]   ;;  %v403_v31 = vshrl.u32 %v3137_v63, 16 }
  0x3c   : > { %2378 = vmatpush3.bf16.msra.mxu0 %v2620_v49  ;;  %1385 = vmatmul.mubr.bf16.vlgmr.msra.gmra.mxu1 %v2113_v24  ;;  %v381_v53 = vor.u32 %v380_v45, %v377_v43  ;;  %v2637_v45 = vld [vmem:[%s3640_s1 + $0x198] sm:$0xff]  }
  0x3d   : > { %2379 = vmatprep.subr.bf16.mxu0 %v2622_v57  ;;  %1327 = vmatprep.mubr.bf16.mxu0 %v2110_v26  ;;  %v367_v49 = vor.u32 %v366_v42, %v363_v41  ;;  %v2631_v57 = vld [vmem:[%s3640_s1 + $0x1e0] sm:$0xff]   ;;  %v3141_v2 = vrot.slane %v481_v52, 4  ;;  %v389_v26 = vshrl.u32 %v3134_v62, 16  ;;  %v400_v41 = vrot.slane %v398_v30, 5 }
  0x3e   : > { %2418 = vmatpush3.bf16.msra.mxu1 %v2621_v20  ;;  %1392 = vmatprep.mubr.bf16.mxu1 %v2118_v28  ;;  %v382_v58 = vrot.slane %v381_v53, 4  ;;  %v2107_v20 = vcombine.low %v3134_v62, %v3137_v63  ;;  %v494_v28 = vrot.slane %v492_v40, 5  ;;  %v405_v42 = vrot.slane %v403_v31, 4  ;;  %v2639_v53 = vld [vmem:[%s3640_s1 + $0x1d0] sm:$0xff]  }
  0x3f   : > { %2419 = vmatprep.subr.bf16.mxu1 %v2623_v25  ;;  %v368_v56 = vrot.slane %v367_v49, 4  ;;  %v2119_v25 = vcombine.low %v3150_v7, %v3153_v8  ;;  %v391_v32 = vrot.slane %v389_v26, 4  ;;  %v2638_v49 = vld [vmem:[%s3640_s1 + $0x150] sm:$0xff]   ;;  %v531_v26 = vshrl.u32 %v3153_v8, 16 }
  0x40   : > { %2380 = vmatpush3.bf16.msra.mxu0 %v2624_v5  ;;  %v3145_v3 = vsel %vm3047_vm2, %v382_v58, %v386_v54  ;;  %v325_v5 = vrot.slane %v3134_v62, 4  ;;  %v2640_v54 = vld [vmem:[%s3640_s1 + $0x110] sm:$0xff]  }
  0x41   : > { %2381 = vmatprep.subr.bf16.mxu0 %v2626_v23  ;;  %v3131_v61 = vsel %vm3047_vm2, %v368_v56, %v372_v44  ;;  %v491_v23 = vrot.slane %v489_v27, 4  ;;  %v406_v27 = vshll.u32 %v3137_v63, 16  ;;  %v517_v56 = vshrl.u32 %v3150_v7, 16 }
  0x42   : > { %2420 = vmatpush3.bf16.msra.mxu1 %v2625_v29  ;;  %v2114_v17 = vcombine.low %v3131_v61, %v3145_v3  ;;  %v2111_v24 = vcombine.low %v325_v5, %v326_v6  ;;  %v392_v29 = vshll.u32 %v3134_v62, 16 }
  0x43   : > { %1328 = vmatmul.mubr.bf16.gmra.mxu0 %v2106_v21  ;;  %2421 = vmatprep.subr.bf16.mxu1 %v2627_v47  ;;  %v301_v21 = vld [vmem:[%s3000_s17 + $0xb0] sm:$0x11]  ;;  %v408_v43 = vrot.slane %v406_v27, 5 }
  0x44   : > { %2382 = vmatpush3.bf16.msra.mxu0 %v2628_v48  ;;  %1393 = vmatmul.mubr.bf16.gmra.mxu1 %v2114_v17  ;;  %v412_v35 = vshll.u32 %v301_v21, 16  ;;  %v394_v40 = vrot.slane %v392_v29, 5  ;;  %v508_v17 = vrot.slane %v506_v16, 5  ;;  %v328_v21 = vrot.slane %v3212_v9, 4  ;;  %v309_v16 = vld [vmem:[%s3000_s17 + $0xf0] sm:$0x11] }
  0x45   : > { %2383 = vmatprep.subr.bf16.mxu0 %v2630_v55  ;;  %1335 = vmatprep.mubr.bf16.mxu0 %v2111_v24  ;;  %v409_v48 = vor.u32 %v408_v43, %v405_v42  ;;  %v495_v55 = vor.u32 %v494_v28, %v491_v23  ;;  %v3222_v23 = vld [vmem:[%s3000_s17 + $0xe8] sm:$0xff]  ;;  %v305_v24 = vld [vmem:[%s3000_s17 + $0xd0] sm:$0x11]  ;;  %v534_v28 = vshll.u32 %v3153_v8, 16  ;;  %v440_v43 = vshll.u32 %v309_v16, 16  ;;  %v2647_v16 = vld [vmem:[%s3640_s1 + $0x1c0] sm:$0xff]  }
  0x46   : > { %2422 = vmatpush3.bf16.msra.mxu1 %v2629_v50  ;;  %1400 = vmatprep.mubr.bf16.mxu1 %v2119_v25  ;;  %v414_v44 = vrot.slane %v412_v35, 5  ;;  %v395_v47 = vor.u32 %v394_v40, %v391_v32  ;;  %v505_v50 = vrot.slane %v503_v60, 4  ;;  %v3209_v60 = vld [vmem:[%s3000_s17 + $0xc0] sm:$0xff]  ;;  %v520_v25 = vshll.u32 %v3150_v7, 16  ;;  %v2642_v35 = vld [vmem:[%s3640_s1 + $0x148] sm:$0xff]  }
  0x47   : > { %2423 = vmatprep.subr.bf16.mxu1 %v2631_v57  ;;  %v410_v52 = vrot.slane %v409_v48, 4  ;;  %v3229_v29 = vrot.slane %v495_v55, 4  ;;  %v2108_v27 = vcombine.low %v3209_v60, %v3212_v9  ;;  %v417_v32 = vshrl.u32 %v3209_v60, 16 }
  0x48   : > { %2384 = vmatpush3.bf16.msra.mxu0 %v2632_v59  ;;  %v396_v51 = vrot.slane %v395_v47, 4  ;;  %v2641_v59 = vld [vmem:[%s3640_s1 + $0x190] sm:$0xff]   ;;  %v431_v40 = vshrl.u32 %v3212_v9, 16  ;;  %v509_v47 = vor.u32 %v508_v17, %v505_v50  ;;  %v2646_v50 = vld [vmem:[%s3640_s1 + $0x140] sm:$0xff]  }
  0x49   : > { %2385 = vmatprep.subr.bf16.mxu0 %v2634_v22  ;;  %v3203_v58 = vsel %vm3047_vm2, %v410_v52, %v414_v44  ;;  %v3219_v22 = vld [vmem:[%s3000_s17 + $0xc8] sm:$0xff]  ;;  %v419_v42 = vrot.slane %v417_v32, 4  ;;  %v2649_v32 = vld [vmem:[%s3640_s1 + $0x180] sm:$0xff]  }
  0x4a   : > { %2424 = vmatpush3.bf16.msra.mxu1 %v2633_v18  ;;  %v3199_v57 = vsel %vm3047_vm2, %v396_v51, %v400_v41  ;;  %v2120_v31 = vcombine.low %v3219_v22, %v3222_v23  ;;  %v434_v41 = vshll.u32 %v3212_v9, 16  ;;  %v2643_v44 = vld [vmem:[%s3640_s1 + $0x1c8] sm:$0xff]   ;;  %v433_v51 = vrot.slane %v431_v40, 4 }
  0x4b   : > { %1336 = vmatmul.mubr.bf16.gmra.mxu0 %v2107_v20  ;;  %2425 = vmatprep.subr.bf16.mxu1 %v2635_v37  ;;  %v2115_v18 = vcombine.low %v3199_v57, %v3203_v58  ;;  %v327_v20 = vrot.slane %v3209_v60, 4  ;;  %v420_v37 = vshll.u32 %v3209_v60, 16  ;;  %v510_v17 = vrot.slane %v509_v47, 4 }
  0x4c   : > { %2386 = vmatpush3.bf16.msra.mxu0 %v2636_v38  ;;  %v426_v38 = vshll.u32 %v305_v24, 16  ;;  %v436_v52 = vrot.slane %v434_v41, 5  ;;  %v454_v40 = vrot.slane %v3070_v14, 4  ;;  %v522_v14 = vrot.slane %v520_v25, 5 }
  0x4d   : > { %2387 = vmatprep.subr.bf16.mxu0 %v2638_v49  ;;  %1401 = vmatmul.mubr.bf16.gmra.mxu1 %v2115_v18  ;;  %v2112_v30 = vcombine.low %v327_v20, %v328_v21  ;;  %v422_v48 = vrot.slane %v420_v37, 5  ;;  %v286_v37 = vld [vmem:[%s3000_s17 + $0x38] sm:$0x11] }
  0x4e   : > { %2426 = vmatpush3.bf16.msra.mxu1 %v2637_v45  ;;  %1408 = vmatprep.mubr.bf16.mxu1 %v2120_v31  ;;  %v2644_v45 = vld [vmem:[%s3640_s1 + $0x108] sm:$0xff]   ;;  %v428_v49 = vrot.slane %v426_v38, 5  ;;  %v2133_v38 = vcombine.low %v322_v36, %v323_v12  ;;  %v2651_v12 = vld [vmem:[%s3641_s2 + $0x38] sm:$0xff]  }
  0x4f   : > { %2427 = vmatprep.subr.bf16.mxu1 %v2639_v53  ;;  %1343 = vmatprep.mubr.bf16.mxu0 %v2112_v30  ;;  %v442_v53 = vrot.slane %v440_v43, 5  ;;  %v423_v55 = vor.u32 %v422_v48, %v419_v42  ;;  %v2648_v30 = vld [vmem:[%s3640_s1 + $0x100] sm:$0xff]   ;;  %v484_v43 = vshll.u32 %v286_v37, 16  ;;  %v3296_v48 = vcombine.low %v452_v46, %v453_v4 }
  0x50   : > { %2388 = vmatpush3.bf16.msra.mxu0 %v2640_v54  ;;  %v2645_v54 = vld [vmem:[%s3640_s1 + $0x188] sm:$0xff]   ;;  %v498_v46 = vshll.u32 %v290_v39, 16 }
  0x51   : > { %2389 = vmatprep.subr.bf16.mxu0 %v2642_v35  ;;  %v424_v18 = vrot.slane %v423_v55, 4  ;;  %v282_v35 = vld [vmem:[%s3000_s17 + $0x18] sm:$0x11]  ;;  %v486_v36 = vrot.slane %v484_v43, 5  ;;  %v2130_v43 = vcombine.low %v3065_v11, %v3134_v62  ;;  %v2657_v11 = vld [vmem:[%s3641_s2 + $0x20] sm:$0xff]  }
  0x52   : > { %2428 = vmatpush3.bf16.msra.mxu1 %v2641_v59  ;;  %v437_v59 = vor.u32 %v436_v52, %v433_v51  ;;  %v470_v42 = vshll.u32 %v282_v35, 16  ;;  %v294_v52 = vld [vmem:[%s3000_s17 + $0x78] sm:$0x11] }
  0x53   : > { %1344 = vmatmul.mubr.bf16.gmra.mxu0 %v2108_v27  ;;  %2429 = vmatprep.subr.bf16.mxu1 %v2643_v44  ;;  %v3266_v31 = vsel %vm3047_vm2, %v424_v18, %v428_v49  ;;  %v2650_v44 = vld [vmem:[%s3640_s1 + $0x238] sm:$0xff]   ;;  %v545_v49 = vshrl.u32 %v3219_v22, 16  ;;  %v487_v25 = vsel %vm3047_vm2, %v3141_v2, %v486_v36  ;;  %v512_v4 = vshll.u32 %v294_v52, 16  ;;  %v2653_v2 = vld [vmem:[%s3641_s2 + $0x30] sm:$0xff]  }
  0x54   : > { %2390 = vmatpush3.bf16.msra.mxu0 %v2644_v45  ;;  %v438_v24 = vrot.slane %v437_v59, 4  ;;  %v519_v45 = vrot.slane %v517_v56, 4  ;;  %v472_v47 = vrot.slane %v470_v42, 5  ;;  %v548_v56 = vshll.u32 %v3219_v22, 16 }
  0x55   : > { %2391 = vmatprep.subr.bf16.mxu0 %v2646_v50  ;;  %v500_v59 = vrot.slane %v498_v46, 5  ;;  %v514_v50 = vrot.slane %v512_v4, 5  ;;  %v456_v36 = vrot.slane %v3150_v7, 4  ;;  %v457_v7 = vrot.slane %v3153_v8, 4 }
  0x56   : > { %2430 = vmatpush3.bf16.msra.mxu1 %v2645_v54  ;;  %v3270_v27 = vsel %vm3047_vm2, %v438_v24, %v442_v53  ;;  %v473_v51 = vsel %vm3047_vm2, %v3139_v1, %v472_v47  ;;  %v2129_v53 = vcombine.low %v3010_v33, %v3062_v10  ;;  %v2652_v54 = vld [vmem:[%s3640_s1 + $0x230] sm:$0xff]   ;;  %v455_v1 = vrot.slane %v3073_v15, 4 }
  0x57   : > { %2431 = vmatprep.subr.bf16.mxu1 %v2647_v16  ;;  %v2116_v41 = vcombine.low %v3266_v31, %v3270_v27  ;;  %v2125_v34 = vcombine.low %v473_v51, %v487_v25  ;;  %v523_v55 = vor.u32 %v522_v14, %v519_v45  ;;  %v2134_v33 = vcombine.low %v324_v13, %v325_v5  ;;  %v298_v16 = vld [vmem:[%s3000_s17 + $0x98] sm:$0x11] }
  0x58   : > { %2392 = vmatpush3.bf16.msra.mxu0 %v2648_v30  ;;  %v533_v10 = vrot.slane %v531_v26, 4  ;;  %v559_v15 = vshrl.u32 %v3222_v23, 16  ;;  %v501_v18 = vsel %vm3047_vm2, %v3229_v29, %v500_v59  ;;  %v515_v24 = vsel %vm3047_vm2, %v510_v17, %v514_v50  ;;  %v302_v30 = vld [vmem:[%s3000_s17 + $0xb8] sm:$0x11]  ;;  %v2654_v26 = vld [vmem:[%s3640_s1 + $0x228] sm:$0xff]  }
  0x59   : > { %1409 = vmatmul.mubr.bf16.gmra.mxu1 %v2116_v41  ;;  %2481 = vmatprep.subr.bf16.mxu0 %v2650_v44  ;;  %v536_v13 = vrot.slane %v534_v28, 5  ;;  %v2126_v5 = vcombine.low %v501_v18, %v515_v24  ;;  %v526_v35 = vshll.u32 %v298_v16, 16  ;;  %v540_v37 = vshll.u32 %v302_v30, 16  ;;  %v2655_v17 = vld [vmem:[%s3641_s2 + $0x28] sm:$0xff]   ;;  %v310_v51 = vld [vmem:[%s3000_s17 + $0xf8] sm:$0x11] }
  0x5a   : > { %2432 = vmatpush3.bf16.msra.mxu1 %v2649_v32  ;;  %1514 = vmatprep.mubr.bf16.mxu1 %v2133_v38  ;;  %v524_v32 = vrot.slane %v523_v55, 4  ;;  %v562_v29 = vshll.u32 %v3222_v23, 16  ;;  %v3341_v38 = vcombine.low %v454_v40, %v455_v1  ;;  %v2135_v40 = vcombine.low %v326_v6, %v327_v20  ;;  %v2661_v16 = vld [vmem:[%s3641_s2 + $0x10] sm:$0xff]  }
  0x5b   : > { %2505 = vmatprep.subr.bf16.mxu1 %v2651_v12  ;;  %1449 = vmatprep.mubr.bf16.mxu0 %v2125_v34  ;;  %v537_v28 = vor.u32 %v536_v13, %v533_v10  ;;  %v528_v41 = vrot.slane %v526_v35, 5  ;;  %v542_v42 = vrot.slane %v540_v37, 5  ;;  %v547_v14 = vrot.slane %v545_v49, 4  ;;  %v311_v34 = vld [vmem:[%s3000_s17 + $0x100] sm:$0xff]  ;;  %v2660_v10 = vld [vmem:[%s3640_s1 + $0x210] sm:$0xff]  }
  0x5c   : > { %1450 = vmatmul.mubr.bf16.vlgmr.msra.gmra.mxu0 %v3296_v48  ;;  %v550_v25 = vrot.slane %v548_v56, 5  ;;  %v561_v52 = vrot.slane %v559_v15, 4  ;;  %v564_v20 = vrot.slane %v562_v29, 5  ;;  %v568_v49 = vshll.u32 %v310_v51, 16  ;;  %v2658_v56 = vld [vmem:[%s3640_s1 + $0x218] sm:$0xff]   ;;  %v2664_v37 = vld [vmem:[%s3640_s1 + $0x200] sm:$0xff]  }
  0x5d   : > { %2482 = vmatpush3.bf16.msra.mxu0 %v2650_v44  ;;  %1457 = vmatprep.mubr.bf16.mxu0 %v2126_v5  ;;  %v2656_v44 = vld [vmem:[%s3640_s1 + $0x220] sm:$0xff]   ;;  %v538_v45 = vrot.slane %v537_v28, 4  ;;  %v529_v47 = vsel %vm3047_vm2, %v524_v32, %v528_v41  ;;  %v573_v55 = vrot.slane %v311_v34, 4  ;;  %v2123_v8 = vcombine.low %v456_v36, %v457_v7  ;;  %v312_v29 = vld [vmem:[%s3000_s17 + $0x110] sm:$0x11] }
  0x5e   : > { %2483 = vmatprep.subr.bf16.mxu0 %v2652_v54  ;;  %v551_v46 = vor.u32 %v550_v25, %v547_v14  ;;  %v575_v30 = vshrl.u32 %v311_v34, 16  ;;  %v578_v13 = vshll.u32 %v311_v34, 16  ;;  %v2132_v35 = vcombine.low %v3212_v9, %v311_v34 }
  0x5f   : > { %v543_v62 = vsel %vm3047_vm2, %v538_v45, %v542_v42  ;;  %v2136_v24 = vcombine.low %v328_v21, %v573_v55  ;;  %v2662_v21 = vld [vmem:[%s3640_s1 + $0x208] sm:$0xff]   ;;  %v2138_v9 = vcombine.low %v3145_v3, %v3199_v57  ;;  %v2139_v28 = vcombine.low %v3203_v58, %v3266_v31 }
  0x60   : > { %v2127_v6 = vcombine.low %v529_v47, %v543_v62  ;;  %v552_v1 = vrot.slane %v551_v46, 4  ;;  %v580_v32 = vrot.slane %v578_v13, 5 }
  0x61   : > { %1515 = vmatmul.mubr.bf16.vlgmr.msra.gmra.mxu1 %v2129_v53  ;;  %2484 = vmatpush3.bf16.msra.mxu0 %v2652_v54  ;;  %v565_v53 = vor.u32 %v564_v20, %v561_v52  ;;  %v570_v54 = vrot.slane %v568_v49, 5 }
  0x62   : > { %2506 = vmatpush3.bf16.msra.mxu1 %v2651_v12  ;;  %1522 = vmatprep.mubr.bf16.mxu1 %v2134_v33  ;;  %v306_v12 = vld [vmem:[%s3000_s17 + $0xd8] sm:$0x11]  ;;  %v2131_v33 = vcombine.low %v3137_v63, %v3209_v60  ;;  %v458_v63 = vrot.slane %v3219_v22, 4  ;;  %v459_v60 = vrot.slane %v3222_v23, 4  ;;  %v2663_v22 = vld [vmem:[%s3641_s2 + $0x8] sm:$0xff]   ;;  %v2137_v23 = vcombine.low %v3078_v19, %v3131_v61  ;;  %s3441_s17 = sand.u32 1, %s2804_s22  }
  0x63   : > { %2507 = vmatprep.subr.bf16.mxu1 %v2653_v2  ;;  %2485 = vmatprep.subr.bf16.mxu0 %v2654_v26  ;;  %v554_v39 = vshll.u32 %v306_v12, 16  ;;  %v566_v59 = vrot.slane %v565_v53, 4  ;;  %v584_v61 = vshll.u32 %v312_v29, 16  ;;  %s2100_s14 = sshll.u32 %s3441_s17, 5 }
  0x64   : > { %1458 = vmatmul.mubr.bf16.gmra.mxu0 %v3341_v38  ;;  %v2124_v5 = vcombine.low %v458_v63, %v459_v60  ;;  %s3454_s15 = scalar_lea.vmem [#allocation2], %s2100_s14  ;;  %s3459_s11 = scalar_lea.vmem [#allocation4], %s2100_s14 }
  0x65   : > { %2486 = vmatpush3.bf16.msra.mxu0 %v2654_v26  ;;  %v556_v4 = vrot.slane %v554_v39, 5  ;;  %1465 = vmatprep.mubr.bf16.mxu0 %v2127_v6  ;;  %v571_v15 = vsel %vm3047_vm2, %v566_v59, %v570_v54  ;;  %v577_v26 = vrot.slane %v575_v30, 4  ;;  %v586_v42 = vrot.slane %v584_v61, 5  ;;  %s1915_s16 = sshll.u32 %s3459_s11, 4  ;;  %s1899_s28 = sshll.u32 %s3454_s15, 4  ;;  %s3476_s16 = int_to_ptr.vmem [resolvable:$true] %s1915_s16  ;;  %s3498_s28 = int_to_ptr.vmem [resolvable:$true] %s1899_s28 }
  0x66   : > { %2508 = vmatpush3.bf16.msra.mxu1 %v2653_v2  ;;  %2487 = vmatprep.subr.bf16.mxu0 %v2656_v44  ;;  %v2659_v2 = vld [vmem:[%s3641_s2 + $0x18] sm:$0xff]   ;;  %s3502_s14 = scalar_lea.sflag [#allocation5], %s1875_s18  ;;  %s2666_s29 = scalar_lea.vmem %s3476_s16, 512 }
  0x67   : > { %2509 = vmatprep.subr.bf16.mxu1 %v2655_v17  ;;  %v557_v50 = vsel %vm3047_vm2, %v552_v1, %v556_v4  ;;  %v581_v19 = vor.u32 %v580_v32, %v577_v26  ;;  %p2667_p11 = scmp.ne.s32.totalorder %s3476_s16, %s2666_s29 }
  0x68   : > { %v2128_v18 = vcombine.low %v557_v50, %v571_v15 }
  0x69   : > { %1523 = vmatmul.mubr.bf16.gmra.mxu1 %v2130_v43  ;;  %2488 = vmatpush3.bf16.msra.mxu0 %v2656_v44  ;;  %v582_v41 = vrot.slane %v581_v19, 4  ;;  %p2668_p12 = pnand %p2667_p11, %p2895_p5 }
  0x6a   : > { %2510 = vmatpush3.bf16.msra.mxu1 %v2655_v17  ;;  %1530 = vmatprep.mubr.bf16.mxu1 %v2135_v40  ;;  %v2665_v17 = vld [vmem:[%s3641_s2] sm:$0xff]  }
  0x6b   : > { %2511 = vmatprep.subr.bf16.mxu1 %v2657_v11  ;;  %2489 = vmatprep.subr.bf16.mxu0 %v2658_v56  ;;  %v587_v43 = vsel %vm3047_vm2, %v582_v41, %v586_v42  ;;  %p2669_p13 = pneg %p2668_p12 }
  0x6c   : > { %1466 = vmatmul.mubr.bf16.gmra.mxu0 %v2123_v8 }
  0x6d   : > { %2490 = vmatpush3.bf16.msra.mxu0 %v2658_v56  ;;  %1473 = vmatprep.mubr.bf16.mxu0 %v2128_v18 }
  0x6e   : > { %2512 = vmatpush3.bf16.msra.mxu1 %v2657_v11  ;;  %2491 = vmatprep.subr.bf16.mxu0 %v2660_v10 }
  0x6f   : > { %2513 = vmatprep.subr.bf16.mxu1 %v2659_v2 }
  0x71   : > { %1531 = vmatmul.mubr.bf16.gmra.mxu1 %v2131_v33  ;;  %2492 = vmatpush3.bf16.msra.mxu0 %v2660_v10 }
  0x72   : > { %2514 = vmatpush3.bf16.msra.mxu1 %v2659_v2  ;;  %1538 = vmatprep.mubr.bf16.mxu1 %v2136_v24 }
  0x73   : > { %2515 = vmatprep.subr.bf16.mxu1 %v2661_v16  ;;  %2493 = vmatprep.subr.bf16.mxu0 %v2662_v21 }
  0x74   : > { %1474 = vmatmul.mubr.bf16.gmra.mxu0 %v2124_v5 }
  0x75   : > { %2494 = vmatpush3.bf16.msra.mxu0 %v2662_v21  ;;  %2497 = vmatprep.mubr.bf16.mxu0 %v2137_v23 }
  0x76   : > { %2516 = vmatpush3.bf16.msra.mxu1 %v2661_v16  ;;  %2495 = vmatprep.subr.bf16.mxu0 %v2664_v37 }
  0x77   : > { %2517 = vmatprep.subr.bf16.mxu1 %v2663_v22 }
  0x79   : > { %1539 = vmatmul.mubr.bf16.gmra.mxu1 %v2132_v35  ;;  %2496 = vmatpush3.bf16.msra.mxu0 %v2664_v37 }
  0x7a   : > { %2518 = vmatpush3.bf16.msra.mxu1 %v2663_v22  ;;  %2521 = vmatprep.mubr.bf16.mxu1 %v3296_v48  ;;  %v2140_v48 = vcombine.low %v3270_v27, %v587_v43 }
  0x7b   : > { %2519 = vmatprep.subr.bf16.mxu1 %v2665_v17 }
  0x7c   : > { %2498 = vmatmul.mubr.bf16.vlgmr.msra.gmra.mxu0 %v2138_v9 }
  0x7d   : > { %2501 = vmatprep.mubr.bf16.mxu0 %v2139_v28 }
  0x7e   : > { %2520 = vmatpush3.bf16.msra.mxu1 %v2665_v17 }
  0x81   : > { %2522 = vmatmul.mubr.bf16.vlgmr.msra.gmra.mxu1 %v3341_v38 }
  0x82   : > { %2525 = vmatprep.mubr.bf16.mxu1 %v2123_v8 }
  0x84   : > { %2502 = vmatmul.mubr.bf16.gmra.mxu0 %v2140_v48 }
  0x89   : > { %2526 = vmatmul.mubr.bf16.gmra.mxu1 %v2124_v5 }
  0xfb   : > { %v2313_v3 = vpop.f32.mrf.mxu0 }
  0xfc   : > { %v2353_v58 = vpop.f32.mrf.mxu1 }
  0xfd   : > { %v2314_v57 = vpop.f32.mrf.mxu0 }
  0xfe   : > { %v2354_v31 = vpop.f32.mrf.mxu1  ;;  %v2315_v28 = vadd.f32 %v2314_v57, %v2313_v3 }
  0xff   : > { %v2316_v44 = vpop.f32.mrf.mxu0  ;;  %v2355_v43 = vadd.f32 %v2354_v31, %v2353_v58 }
 0x100   : > { %v2356_v40 = vpop.f32.mrf.mxu1 }
 0x101   : > { %v2317_v45 = vpop.f32.mrf.mxu0  ;;  %v1387_v3 = vadd.f32 %v2355_v43, %v2315_v28 }
 0x102   : > { %v2357_v14 = vpop.f32.mrf.mxu1  ;;  %v2318_v48 = vadd.f32 %v2317_v45, %v2316_v44 }
 0x103   : > { %v2319_v47 = vpop.f32.mrf.mxu0 }
 0x104   : > { %v2359_v11 = vpop.f32.mrf.mxu1 }
 0x105   : > { %v2320_v36 = vpop.f32.mrf.mxu0 }
 0x106   : > { %v2360_v62 = vpop.f32.mrf.mxu1  ;;  %v2321_v17 = vadd.f32 %v2320_v36, %v2319_v47 }
 0x107   : > { %v2322_v12 = vpop.f32.mrf.mxu0  ;;  %v2361_v19 = vadd.f32 %v2360_v62, %v2359_v11 }
 0x108   : > { %v2362_v51 = vpop.f32.mrf.mxu1 }
 0x109   : > { %v2323_v0 = vpop.f32.mrf.mxu0 }
 0x10a   : > { %v2363_v39 = vpop.f32.mrf.mxu1  ;;  %v2324_v41 = vadd.f32 %v2323_v0, %v2322_v12 }
 0x10b   : > { %v2325_v38 = vpop.f32.mrf.mxu0  ;;  %v2364_v42 = vadd.f32 %v2363_v39, %v2362_v51 }
 0x10d   : > { %v2326_v25 = vpop.f32.mrf.mxu0  ;;  %v2365_v6 = vpop.f32.mrf.mxu1  ;;  %v1398_v36 = vadd.f32 %v2364_v42, %v2324_v41 }
 0x10f   : > { %v3412_v27 = vpop.f32.mrf.mxu0  ;;  %v2366_v7 = vpop.f32.mrf.mxu1 }
 0x111   : > { %v3414_v52 = vpop.f32.mrf.mxu0  ;;  %v3416_v49 = vpop.f32.mrf.mxu1 }
 0x112   : > { %3653 = vst [vmem:[#allocation12_spill] sm:$0xff] %v3414_v52  ;;  %3654 = vst [vmem:[#allocation13_spill] sm:$0xff] %v3416_v49  ;;  %v1395_v49 = vadd.f32 %v2361_v19, %v2321_v17 }
 0x113   : > { %v2331_v20 = vpop.f32.mrf.mxu0  ;;  %v2369_v46 = vpop.f32.mrf.mxu1 }
 0x115   : > { %v2332_v34 = vpop.f32.mrf.mxu0 }
 0x116   : > { %v2333_v11 = vadd.f32 %v2332_v34, %v2331_v20 }
 0x117   : > { %v3418_v4 = vpop.f32.mrf.mxu0 }
 0x118   : > { %3655 = vst [vmem:[#allocation14_spill] sm:$0xff] %v3418_v4 }
 0x119   : > { %v2371_v56 = vpop.f32.mrf.mxu1  ;;  %v2335_v54 = vpop.f32.mrf.mxu0  ;;  %v3664_v12 = vld [vmem:[#allocation12_spill] sm:$0xff]  ;;  %v3665_v0 = vld [vmem:[#allocation13_spill] sm:$0xff] }
 0x11b   : > { %v2372_v53 = vpop.f32.mrf.mxu1 }
 0x11c   : > { %v2393_v8 = vpop.f32.mrf.mxu0  ;;  %v2373_v62 = vadd.f32 %v2372_v53, %v2371_v56 }
 0x11d   : > { %v3420_v1 = vpop.f32.mrf.mxu1 }
 0x11e   : > { %3656 = vst [vmem:[#allocation15_spill] sm:$0xff] %v3420_v1  ;;  %v2394_v59 = vpop.f32.mrf.mxu0  ;;  %v2367_v1 = vadd.f32 %v2366_v7, %v2365_v6 }
 0x11f   : > { %v3422_v55 = vpop.f32.mrf.mxu1 }
 0x120   : > { %3657 = vst [vmem:[#allocation16_spill] sm:$0xff] %v3422_v55  ;;  %v2396_v33 = vpop.f32.mrf.mxu0  ;;  %v2327_v55 = vadd.f32 %v2326_v25, %v2325_v38  ;;  %v2370_v38 = vadd.f32 %v2369_v46, %v3665_v0  ;;  %v3666_v25 = vld [vmem:[#allocation14_spill] sm:$0xff] }
 0x121   : > { %v3424_v2 = vpop.f32.mrf.mxu1  ;;  %v2336_v39 = vadd.f32 %v2335_v54, %v3666_v25 }
 0x122   : > { %3658 = vst [vmem:[#allocation17_spill] sm:$0xff] %v3424_v2  ;;  %v2397_v15 = vpop.f32.mrf.mxu0 }
 0x123   : > { %v3426_v50 = vpop.f32.mrf.mxu1 }
 0x124   : > { %3659 = vst [vmem:[#allocation18_spill] sm:$0xff] %v3426_v50  ;;  %v2399_v24 = vpop.f32.mrf.mxu0 }
 0x125   : > { %v3428_v10 = vpop.f32.mrf.mxu1  ;;  %v3667_v53 = vld [vmem:[#allocation15_spill] sm:$0xff] }
 0x126   : > { %3660 = vst [vmem:[#allocation19_spill] sm:$0xff] %v3428_v10  ;;  %v2400_v63 = vpop.f32.mrf.mxu0 }
 0x127   : > { %v3430_v18 = vpop.f32.mrf.mxu1  ;;  %v2401_v10 = vadd.f32 %v2400_v63, %v2399_v24 }
 0x128   : > { %3661 = vst [vmem:[#allocation20_spill] sm:$0xff] %v3430_v18  ;;  %v2402_v30 = vpop.f32.mrf.mxu0  ;;  %v2358_v18 = vadd.f32 %v2357_v14, %v2356_v40  ;;  %v1403_v40 = vadd.f32 %v2367_v1, %v2327_v55  ;;  %v2330_v14 = vadd.f32 %v3664_v12, %v3412_v27 }
 0x129   : > { %v2439_v16 = vpop.f32.mrf.mxu1  ;;  %v1460_v58 = vadd.f32 %v2401_v10, %v1395_v49  ;;  %v1411_v49 = vadd.f32 %v2373_v62, %v2333_v11  ;;  %v3669_v27 = vld [vmem:[#allocation17_spill] sm:$0xff] }
 0x12a   : > { %v2403_v21 = vpop.f32.mrf.mxu0  ;;  %v1390_v57 = vadd.f32 %v2358_v18, %v2318_v48 }
 0x12b   : > { %v2440_v60 = vpop.f32.mrf.mxu1  ;;  %v2404_v4 = vadd.f32 %v2403_v21, %v2402_v30 }
 0x12c   : > { %v2405_v22 = vpop.f32.mrf.mxu0  ;;  %v2441_v7 = vadd.f32 %v2440_v60, %v2439_v16 }
 0x12d   : > { %v2442_v13 = vpop.f32.mrf.mxu1  ;;  %v1463_v51 = vadd.f32 %v2404_v4, %v1398_v36  ;;  %v3671_v24 = vld [vmem:[#allocation19_spill] sm:$0xff] }
 0x12e   : > { %v2406_v26 = vpop.f32.mrf.mxu0  ;;  %v1525_v54 = vadd.f32 %v2441_v7, %v1460_v58 }
 0x12f   : > { %v2443_v5 = vpop.f32.mrf.mxu1  ;;  %v2407_v44 = vadd.f32 %v2406_v26, %v2405_v22  ;;  %v3672_v16 = vld [vmem:[#allocation20_spill] sm:$0xff] }
 0x130   : > { %v2408_v35 = vpop.f32.mrf.mxu0  ;;  %v2438_v63 = vadd.f32 %v3672_v16, %v3671_v24 }
 0x131   : > { %v2445_v23 = vpop.f32.mrf.mxu1  ;;  %v1468_v4 = vadd.f32 %v2407_v44, %v1403_v40 }
 0x132   : > { %v2409_v29 = vpop.f32.mrf.mxu0 }
 0x133   : > { %v2446_v32 = vpop.f32.mrf.mxu1  ;;  %v2410_v10 = vadd.f32 %v2409_v29, %v2408_v35 }
 0x134   : > { %v2411_v9 = vpop.f32.mrf.mxu0  ;;  %v2447_v21 = vadd.f32 %v2446_v32, %v2445_v23 }
 0x135   : > { %v3432_v37 = vpop.f32.mrf.mxu1 }
 0x136   : > { %3662 = vst [vmem:[#allocation21_spill] sm:$0xff] %v3432_v37  ;;  %v2412_v2 = vpop.f32.mrf.mxu0  ;;  %v2395_v37 = vadd.f32 %v2394_v59, %v2393_v8  ;;  %v3668_v8 = vld [vmem:[#allocation16_spill] sm:$0xff]  ;;  %v2444_v59 = vadd.f32 %v2443_v5, %v2442_v13  ;;  %v1533_v42 = vadd.f32 %v2447_v21, %v1468_v4 }
 0x137   : > { %v3434_v61 = vpop.f32.mrf.mxu1  ;;  %v2413_v20 = vadd.f32 %v2412_v2, %v2411_v9  ;;  %v2376_v1 = vadd.f32 %v3668_v8, %v3667_v53  ;;  %v1406_v2 = vadd.f32 %v2370_v38, %v2330_v14 }
 0x138   : > { %3663 = vst [vmem:[#allocation22_spill] sm:$0xff] %v3434_v61  ;;  %v2414_v47 = vpop.f32.mrf.mxu0  ;;  %v2398_v61 = vadd.f32 %v2397_v15, %v2396_v33  ;;  %v1452_v6 = vadd.f32 %v2395_v37, %v1387_v3  ;;  %v3670_v33 = vld [vmem:[#allocation18_spill] sm:$0xff]  ;;  %v1528_v30 = vadd.f32 %v2444_v59, %v1463_v51 }
 0x139   : > { %v2451_v50 = vpop.f32.mrf.mxu1  ;;  %v2435_v46 = vadd.f32 %v3670_v33, %v3669_v27  ;;  %v1476_v22 = vadd.f32 %v2413_v20, %v1411_v49  ;;  %v1414_v17 = vadd.f32 %v2376_v1, %v2336_v39  ;;  %v1471_v35 = vadd.f32 %v2410_v10, %v1406_v2 }
 0x13a   : > { %v2415_v31 = vpop.f32.mrf.mxu0  ;;  %v1455_v55 = vadd.f32 %v2398_v61, %v1390_v57 }
 0x13b   : > { %v2452_v52 = vpop.f32.mrf.mxu1  ;;  %v2416_v60 = vadd.f32 %v2415_v31, %v2414_v47  ;;  %v1517_v37 = vadd.f32 %v2435_v46, %v1452_v6 }
 0x13c   : > { %v2499_v56 = vpop.f32.mrf.mxu0  ;;  %v1520_v61 = vadd.f32 %v2438_v63, %v1455_v55  ;;  %v2453_v29 = vadd.f32 %v2452_v52, %v2451_v50 }
 0x13d   : > { %v2454_v45 = vpop.f32.mrf.mxu1  ;;  %v1590_v26 = vadd.f32 %v2499_v56, %v1525_v54  ;;  %v3673_v43 = vld [vmem:[#allocation21_spill] sm:$0xff]  ;;  %v1479_v23 = vadd.f32 %v2416_v60, %v1414_v17 }
 0x13e   : > { %v1581_v18 = vpop.f32.mrf.mxu0  ;;  %v1541_v58 = vadd.f32 %v2453_v29, %v1476_v22 }
 0x13f   : > { %v2455_v34 = vpop.f32.mrf.mxu1  ;;  %v1582_v9 = vadd.f32 %v1581_v18, %v1517_v37  ;;  %v3674_v48 = vld [vmem:[#allocation22_spill] sm:$0xff]  ;;  %v1643_v62 = vmul.f32 %v1590_v26, %v1590_v26 }
 0x140   : > { %v2500_v5 = vpop.f32.mrf.mxu0  ;;  %v2450_v47 = vadd.f32 %v3674_v48, %v3673_v43  ;;  %v2456_v11 = vadd.f32 %v2455_v34, %v2454_v45 }
 0x141   : > { %v2523_v15 = vpop.f32.mrf.mxu1  ;;  %v1593_v19 = vadd.f32 %v2500_v5, %v1528_v30  ;;  %v1641_v40 = vmul.f32 %v1582_v9, %v1582_v9 }
 0x142   : > { %v1584_v41 = vpop.f32.mrf.mxu0  ;;  %v1849_v25 = vmul.f32 %v2523_v15, %v2523_v15  ;;  %v1544_v7 = vadd.f32 %v2456_v11, %v1479_v23  ;;  %v1536_v54 = vadd.f32 %v2450_v47, %v1471_v35 }
 0x143   : > { %v1763_v13 = vpop.f32.mrf.mxu1  ;;  %v2259_v32 = vpack.c.bf16 %v1593_v19, %v1590_v26  ;;  %v1585_v3 = vadd.f32 %v1584_v41, %v1520_v61  ;;  %v1644_v33 = vmul.f32 %v1593_v19, %v1593_v19 }
 0x144   : > { %v2503_v44 = vpop.f32.mrf.mxu0  ;;  %v1847_v31 = vmul.f32 %v1763_v13, %v1763_v13 }
 0x145   : > { %v2524_v28 = vpop.f32.mrf.mxu1  ;;  %2291 = vst [vmem:[%s3454_s15 + $0x8] sm:$0xff] %v2259_v32   ;;  %v2254_v12 = vpack.c.bf16 %v1585_v3, %v1582_v9  ;;  %v1628_v14 = vadd.f32 %v1585_v3, %v1582_v9  ;;  %v1642_v0 = vmul.f32 %v1585_v3, %v1585_v3  ;;  %v3467_v55 = vadd.f32 %v2503_v44, %v1541_v58 }
 0x146   : > { %v2279_v36 = vpack.c.bf16 %v2524_v28, %v2523_v15  ;;  %v1597_v51 = vpop.f32.mrf.mxu0  ;;  %v1850_v20 = vmul.f32 %v2524_v28, %v2524_v28 }
 0x147   : > { %v1766_v57 = vpop.f32.mrf.mxu1  ;;  %2255 = vst [vmem:[%s3454_s15] sm:$0xff] %v2254_v12   ;;  %v1629_v34 = vadd.f32 %v1628_v14, %v1590_v26  ;;  %v1649_v56 = vadd.f32 %v1642_v0, %v1641_v40  ;;  %v3465_v49 = vadd.f32 %v1597_v51, %v1533_v42 }
 0x148   : > { %2294 = vst [vmem:[%s3459_s11 + $0x8] sm:$0xff] %v2279_v36   ;;  %v2274_v52 = vpack.c.bf16 %v1766_v57, %v1763_v13  ;;  %v1834_v50 = vadd.f32 %v1766_v57, %v1763_v13  ;;  %v1848_v45 = vmul.f32 %v1766_v57, %v1766_v57  ;;  %v2504_v8 = vpop.f32.mrf.mxu0 }
 0x149   : > { %v2527_v38 = vpop.f32.mrf.mxu1  ;;  %v3469_v27 = vadd.f32 %v2504_v8, %v1544_v7  ;;  %v1650_v46 = vadd.f32 %v1649_v56, %v1643_v62  ;;  %v1630_v4 = vadd.f32 %v1629_v34, %v1593_v19  ;;  %v1645_v60 = vmul.f32 %v3465_v49, %v3465_v49 }
 0x14a   : > { %2275 = vst [vmem:[%s3459_s11] sm:$0xff] %v2274_v52   ;;  %v1835_v39 = vadd.f32 %v2523_v15, %v1834_v50  ;;  %v1855_v6 = vadd.f32 %v1848_v45, %v1847_v31  ;;  %v1600_v15 = vpop.f32.mrf.mxu0 }
 0x14b   : > { %v1779_v53 = vpop.f32.mrf.mxu1  ;;  %v2269_v16 = vpack.c.bf16 %v3469_v27, %v3467_v55  ;;  %v1631_v63 = vadd.f32 %v1630_v4, %v3465_v49  ;;  %v1651_v30 = vadd.f32 %v1650_v46, %v1644_v33  ;;  %v1601_v37 = vadd.f32 %v1600_v15, %v1536_v54 }
 0x14c   : > { %v1856_v1 = vadd.f32 %v1855_v6, %v1849_v25  ;;  %v1836_v59 = vadd.f32 %v2524_v28, %v1835_v39  ;;  %v1851_v2 = vmul.f32 %v1779_v53, %v1779_v53  ;;  %v1853_v28 = vmul.f32 %v2527_v38, %v2527_v38 }
 0x14d   : > { %v3472_v10 = vpop.f32.mrf.mxu1  ;;  %2293 = vst [vmem:[%s3454_s15 + $0x18] sm:$0xff] %v2269_v16   ;;  %v1652_v17 = vadd.f32 %v1651_v30, %v1645_v60  ;;  %v2264_v61 = vpack.c.bf16 %v1601_v37, %v3465_v49  ;;  %v1632_v35 = vadd.f32 %v1631_v63, %v1601_v37  ;;  %v1646_v29 = vmul.f32 %v1601_v37, %v1601_v37 }
 0x14e   : > { %v1837_v18 = vadd.f32 %v1836_v59, %v1779_v53  ;;  %v1857_v24 = vadd.f32 %v1856_v1, %v1850_v20  ;;  %v2289_v21 = vpack.c.bf16 %v3472_v10, %v2527_v38 }
 0x14f   : > { %v1782_v22 = vpop.f32.mrf.mxu1 }
 0x150   : > { %v1858_v26 = vadd.f32 %v1857_v24, %v1851_v2  ;;  %v2284_v13 = vpack.c.bf16 %v1782_v22, %v1779_v53  ;;  %v1838_v5 = vadd.f32 %v1837_v18, %v1782_v22  ;;  %2296 = vst [vmem:[%s3459_s11 + $0x18] sm:$0xff] %v2289_v21   ;;  %v1852_v19 = vmul.f32 %v1782_v22, %v1782_v22 }
 0x152   : > { %2295 = vst [vmem:[%s3459_s11 + $0x10] sm:$0xff] %v2284_v13   ;;  %v1839_v9 = vadd.f32 %v2527_v38, %v1838_v5  ;;  %v1859_v41 = vadd.f32 %v1858_v26, %v1852_v19  ;;  %s2670_s11 = sshll.u32 %s2814_s20, 4  ;;  %s2671_s11 = int_to_ptr.vmem [resolvable:$false] %s2670_s11 }
 0x153   : > { %s2672_s26 = scalar_lea.vmem %s2671_s11, 1024  ;;  %p2673_p0 = scmp.lt.s32.totalorder %s3476_s16, %s2671_s11 }
 0x154   : > { %p2674_p1 = scmp.lt.s32.totalorder %s2672_s26, %s2666_s29 }
 0x156   : > { %p2675_p2 = por %p2674_p1, %p2673_p0 }
 0x158   : > { %p2676_p3 = pnand %p2675_p2, %p2669_p13 }
 0x15a   : > { %2679 = shalt.err (!%p2676_p3)
}
 0x15b   : > { %s2680_s18 = scalar_lea.hbm %s3488_s9, 512  ;;  %s2684_s12 = scalar_lea.hbm %s3643_s4, 1024 }
 0x15c   : > { %p2681_p4 = scmp.ne.s32.totalorder %s3488_s9, %s2680_s18  ;;  %p2685_p9 = scmp.lt.s32.totalorder %s3488_s9, %s3643_s4 }
 0x15d   : > { %p2686_p10 = scmp.lt.s32.totalorder %s2684_s12, %s2680_s18 }
 0x15e   : > { %p2682_p7 = pnand %p2681_p4, %p2895_p5 }
 0x15f   : > { %p2687_p11 = por %p2686_p10, %p2685_p9 }
 0x160   : > { %p2683_p8 = pneg %p2682_p7 }
 0x162   : > { %p2688_p12 = pnand %p2687_p11, %p2683_p8 }
 0x164   : > { %2691 = shalt.err (!%p2688_p12)
}
 0x165   : > { %s2815_s26 = smov 64   ;;  %s2816_s29 = smov 4   ;;  %v1647_v42 = vmul.f32 %v3467_v55, %v3467_v55  ;;  %2292 = vst [vmem:[%s3454_s15 + $0x10] sm:$0xff] %v2264_v61   ;;  %v1633_v43 = vadd.f32 %v1632_v35, %v3467_v55  ;;  %v1653_v48 = vadd.f32 %v1652_v17, %v1646_v29  ;;  %v1840_v47 = vadd.f32 %v3472_v10, %v1839_v9 }
 0x166   : > { %2531 = dma.vmem_to_hbm [thread:$0]  (%p2895_p5), %s3476_s16, 512, %s3488_s9, %s3502_s14, %s2815_s26, %s2815_s26, %s2816_s29   ;;  %v1854_v23 = vmul.f32 %v3472_v10, %v3472_v10  ;;  %v1860_v32 = vadd.f32 %v1859_v41, %v1853_v28 }
 0x167   : > { %s1871_s0 = scalar_lea.sflag [#allocation3], %s3441_s17  ;;  %s2692_s11 = scalar_lea.vmem %s3498_s28, 512 }
 0x168   : > { %p2693_p13 = scmp.ne.s32.totalorder %s3498_s28, %s2692_s11  ;;  %s2817_s16 = smov [#allocation2]  }
 0x169   : > { %s2696_s9 = sshll.u32 %s2817_s16, 4  ;;  %s2697_s9 = int_to_ptr.vmem [resolvable:$false] %s2696_s9 }
 0x16a   : > { %p2694_p0 = pnand %p2693_p13, %p2895_p5  ;;  %s2698_s18 = scalar_lea.vmem %s2697_s9, 1024 }
 0x16b   : > { %p2699_p2 = scmp.lt.s32.totalorder %s3498_s28, %s2697_s9  ;;  %p2700_p3 = scmp.lt.s32.totalorder %s2698_s18, %s2692_s11 }
 0x16c   : > { %p2695_p1 = pneg %p2694_p0 }
 0x16d   : > { %p2701_p4 = por %p2700_p3, %p2699_p2 }
 0x16f   : > { %p2702_p7 = pnand %p2701_p4, %p2695_p1 }
 0x171   : > { %2705 = shalt.err (!%p2702_p7)
}
 0x172   : > { %s2706_s15 = scalar_lea.hbm %s3496_s13, 512  ;;  %s2710_s12 = scalar_lea.hbm %s3642_s3, 1024 }
 0x173   : > { %p2707_p8 = scmp.ne.s32.totalorder %s3496_s13, %s2706_s15  ;;  %p2711_p11 = scmp.lt.s32.totalorder %s3496_s13, %s3642_s3 }
 0x174   : > { %p2712_p12 = scmp.lt.s32.totalorder %s2710_s12, %s2706_s15 }
 0x175   : > { %p2708_p9 = pnand %p2707_p8, %p2895_p5 }
 0x176   : > { %p2713_p13 = por %p2712_p12, %p2711_p11 }
 0x177   : > { %p2709_p10 = pneg %p2708_p9 }
 0x179   : > { %p2714_p0 = pnand %p2713_p13, %p2709_p10 }
 0x17b   : > { %2717 = shalt.err (!%p2714_p0)
}
 0x17c   : > { %2530 = dma.vmem_to_hbm [thread:$0]  (%p2895_p5), %s3498_s28, 512, %s3496_s13, %s1871_s0, %s2815_s26, %s2815_s26, %s2816_s29   ;;  %v1648_v36 = vmul.f32 %v3469_v27, %v3469_v27  ;;  %v1634_v11 = vadd.f32 %v1633_v43, %v3469_v27  ;;  %v1654_v62 = vadd.f32 %v1653_v48, %v1647_v42  ;;  %v1841_v3 = vrot.slane %v1840_v47, 4 }
 0x17d   : > { %v1861_v57 = vadd.f32 %v1860_v32, %v1854_v23  ;;  %s2102_s11 = sshll.u32 %s3441_s17, 1  ;;  %s2237_s28 = sshll.u32 %s2876_s25, 5  ;;  %vm1662_vm3 = vcmask 1040384  }
 0x17e   : > { %v1635_v58 = vrot.slane %v1634_v11, 4  ;;  %v1655_v44 = vadd.f32 %v1654_v62, %v1648_v36  ;;  %v1842_v31 = vadd.f32 %v1841_v3, %v1840_v47  ;;  %s272_s13 = scalar_lea.vmem [#allocation7], %s2102_s11  ;;  %s265_s29 = scalar_lea.vmem [#allocation6], %s2102_s11 }
 0x17f   : > { %v1862_v52 = vrot.slane %v1861_v57, 4  ;;  %s1944_s26 = sshll.u32 %s272_s13, 4  ;;  %s1931_s0 = sshll.u32 %s265_s29, 4  ;;  %s3569_s26 = int_to_ptr.vmem [resolvable:$true] %s1944_s26  ;;  %s3576_s0 = int_to_ptr.vmem [resolvable:$true] %s1931_s0 }
 0x180   : > { %v1636_v50 = vadd.f32 %v1635_v58, %v1634_v11  ;;  %v1656_v45 = vrot.slane %v1655_v44, 4  ;;  %v1843_v40 = vrot.slane %v1842_v31, 2  ;;  %s3567_s15 = scalar_lea.hbm %s3645_s6, %s2237_s28  ;;  %s3574_s10 = scalar_lea.hbm %s3644_s5, %s2237_s28 }
 0x181   : > { %v1863_v12 = vadd.f32 %v1862_v52, %v1861_v57  ;;  %s1886_s12 = scalar_lea.sflag [#allocation8], %s3441_s17  ;;  %s2718_s20 = scalar_lea.vmem %s3569_s26, 32 }
 0x182   : > { %v1637_v14 = vrot.slane %v1636_v50, 2  ;;  %v1657_v0 = vadd.f32 %v1656_v45, %v1655_v44  ;;  %v1844_v38 = vadd.f32 %v1843_v40, %v1842_v31  ;;  %p2719_p1 = scmp.ne.s32.totalorder %s3569_s26, %s2718_s20  ;;  %s2818_s16 = smov [#allocation7]  }
 0x183   : > { %v1864_v51 = vrot.slane %v1863_v12, 2  ;;  %s2722_s11 = sshll.u32 %s2818_s16, 4  ;;  %s2723_s11 = int_to_ptr.vmem [resolvable:$false] %s2722_s11 }
 0x184   : > { %v1638_v25 = vadd.f32 %v1637_v14, %v1636_v50  ;;  %v1658_v39 = vrot.slane %v1657_v0, 2  ;;  %v1845_v6 = vrot.slane %v1844_v38, 1  ;;  %p2720_p2 = pnand %p2719_p1, %p2895_p5  ;;  %s2724_s9 = scalar_lea.vmem %s2723_s11, 64 }
 0x185   : > { %v1865_v7 = vadd.f32 %v1864_v51, %v1863_v12  ;;  %p2725_p4 = scmp.lt.s32.totalorder %s3569_s26, %s2723_s11  ;;  %p2726_p7 = scmp.lt.s32.totalorder %s2724_s9, %s2718_s20 }
 0x186   : > { %v1639_v20 = vrot.slane %v1638_v25, 1  ;;  %v1659_v34 = vadd.f32 %v1658_v39, %v1657_v0  ;;  %v1846_v53 = vadd.f32 %v1845_v6, %v1844_v38  ;;  %p2721_p3 = pneg %p2720_p2 }
 0x187   : > { %v1866_v56 = vrot.slane %v1865_v7, 1  ;;  %p2727_p8 = por %p2726_p7, %p2725_p4 }
 0x188   : > { %v1660_v49 = vrot.slane %v1659_v34, 1  ;;  %v1640_v1 = vadd.f32 %v1639_v20, %v1638_v25 }
 0x189   : > { %v1867_v8 = vadd.f32 %v1866_v56, %v1865_v7  ;;  %p2728_p9 = pnand %p2727_p8, %p2721_p3 }
 0x18a   : > { %v1661_v55 = vadd.f32 %v1660_v49, %v1659_v34 }
 0x18b   : > { %v1868_v59 = vsel %vm1662_vm3, %v1846_v53, %v1867_v8 }
 0x18c   : > { %v1663_v27 = vsel %vm1662_vm3, %v1640_v1, %v1661_v55  ;;  %1869 = vst [vmem:[%s272_s13] sm:$0x3] %v1868_v59 }
 0x18d   : > { %1664 = vst [vmem:[%s265_s29] sm:$0x3] %v1663_v27 }
 0x18e   : > { %2731 = shalt.err (!%p2728_p9)
}
 0x18f   : > { %s2732_s28 = scalar_lea.hbm %s3567_s15, 32  ;;  %s2736_s29 = scalar_lea.hbm %s3645_s6, 64 }
 0x190   : > { %p2733_p10 = scmp.ne.s32.totalorder %s3567_s15, %s2732_s28  ;;  %p2737_p13 = scmp.lt.s32.totalorder %s3567_s15, %s3645_s6 }
 0x191   : > { %p2738_p0 = scmp.lt.s32.totalorder %s2736_s29, %s2732_s28 }
 0x192   : > { %p2734_p11 = pnand %p2733_p10, %p2895_p5 }
 0x193   : > { %p2739_p1 = por %p2738_p0, %p2737_p13 }
 0x194   : > { %p2735_p12 = pneg %p2734_p11 }
 0x196   : > { %p2740_p2 = pnand %p2739_p1, %p2735_p12 }
 0x198   : > { %2743 = shalt.err (!%p2740_p2)
}
 0x199   : > { %2533 = dma.vmem_to_hbm [thread:$0]  (%p2895_p5), %s3569_s26, 32, %s3567_s15, %s1886_s12  }
 0x19a   : > { %s2744_s19 = scalar_lea.vmem %s3576_s0, 32  ;;  %s2819_s20 = smov [#allocation6]  }
 0x19b   : > { %p2745_p3 = scmp.ne.s32.totalorder %s3576_s0, %s2744_s19  ;;  %s2748_s16 = sshll.u32 %s2819_s20, 4  ;;  %s2749_s16 = int_to_ptr.vmem [resolvable:$false] %s2748_s16 }
 0x19c   : > { %s2750_s11 = scalar_lea.vmem %s2749_s16, 64  ;;  %p2751_p8 = scmp.lt.s32.totalorder %s3576_s0, %s2749_s16 }
 0x19d   : > { %p2746_p4 = pnand %p2745_p3, %p2895_p5  ;;  %p2752_p9 = scmp.lt.s32.totalorder %s2750_s11, %s2744_s19 }
 0x19f   : > { %p2747_p7 = pneg %p2746_p4  ;;  %p2753_p10 = por %p2752_p9, %p2751_p8 }
 0x1a1   : > { %p2754_p11 = pnand %p2753_p10, %p2747_p7 }
 0x1a3   : > { %2757 = shalt.err (!%p2754_p11)
}
 0x1a4   : > { %s2758_s9 = scalar_lea.hbm %s3574_s10, 32  ;;  %s2762_s12 = scalar_lea.hbm %s3644_s5, 64 }
 0x1a5   : > { %p2759_p12 = scmp.ne.s32.totalorder %s3574_s10, %s2758_s9  ;;  %p2763_p1 = scmp.lt.s32.totalorder %s3574_s10, %s3644_s5 }
 0x1a6   : > { %p2764_p2 = scmp.lt.s32.totalorder %s2762_s12, %s2758_s9 }
 0x1a7   : > { %p2760_p13 = pnand %p2759_p12, %p2895_p5 }
 0x1a8   : > { %p2765_p3 = por %p2764_p2, %p2763_p1 }
 0x1a9   : > { %p2761_p0 = pneg %p2760_p13 }
 0x1ab   : > { %p2766_p4 = pnand %p2765_p3, %p2761_p0 }
 0x1ad   : > { %2769 = shalt.err (!%p2766_p4)
}
 0x1ae   : > { %2532 = dma.vmem_to_hbm [thread:$0]  (%p2895_p5), %s3576_s0, 32, %s3574_s10, %s3502_s14  }
 0x1af PF: > { %p2551_p7 = scmp.ge.s32.totalorder %s2812_s24, 2  ;;  %s1956_s13 = sand.u32 1, %s2800_s21  }
 0x1b0   : > { %s1957_s29 = scalar_lea.sflag [#allocation3], %s1956_s13 }
 0x1b1   : > { %p2539_p8 = pnand %p2551_p7, %p2899_p6 }
 0x1b3   : > { %p2540_p9 = pneg %p2539_p8 }
 0x1b5   : > { %2787 = dma.done.wait (%p2540_p9), %s1957_s29, 512  }
 0x1b6   : > { %2789 = vsyncadd (%p2540_p9), %s1957_s29, 4294966784  ;;  %s3675_s18 = sadd.s32 4294967294, %s2812_s24  }
 0x1b7   : > { %s1965_s25 = sand.u32 1, %s3675_s18  }
 0x1b8   : > { %s1966_s7 = scalar_lea.sflag [#allocation5], %s1965_s25 }
 0x1b9   : > { %2791 = dma.done.wait (%p2540_p9), %s1966_s7, 544  }
 0x1ba   : > { %2793 = vsyncadd (%p2540_p9), %s1966_s7, 4294966752  ;;  %s1984_s19 = scalar_lea.sflag [#allocation8], %s1956_s13 }
 0x1bb   : > { %2795 = dma.done.wait (%p2540_p9), %s1984_s19, 32  }
 0x1bc   : > { %2797 = vsyncadd (%p2540_p9), %s1984_s19, 4294967264  ;;  %p23_p5 = scmp.ge.s32.totalorder %s2880_s27, 4   ;;  %s3676_s21 = smov %s2804_s22 }
 0x1bd   : > { %s3677_s22 = smov %s2808_s23  ;;  %s3678_s23 = smov %s2893_s30 }
 0x1be   : > { %s3679_s24 = smov %s2880_s27  ;;  %25 = sbr.rel (!%p23_p5) target bundleno = 9 (0x9), region = 116 }
 0x1c3   :  { %1989 = vsyncpa [#allocation3], 1 }
 0x1c4   :  { %1991 = vsyncpa [#allocation3 + $0x1], 1 }
 0x1c5   :  { %1992 = vsyncpa [#allocation5], 1 }
 0x1c6   :  { %1994 = vsyncpa [#allocation5 + $0x1], 1 }
 0x1c7   :  { %1995 = vsyncpa [#allocation8], 1 }
 0x1c8   :  { %1997 = vsyncpa [#allocation8 + $0x1], 1 }

</bundles_post_ra>
